<compile_context>
chip_gen: v5e
topology: v5e:2x2
jax: 0.10.0
libtpu: 0.0.40
codegen_flags: <defaults>
</compile_context>

<pallas_src>
import jax
import jax.numpy as jnp
from jax import lax
from jax.experimental import pallas as pl
from jax.experimental.pallas import tpu as pltpu

_K = 7            # conv kernel size (fixed by the module)
_P = 3            # conv padding     (fixed by the module)
_KK = _K * _K     # 49


def _spatial_attn_kernel(w_ref, b_ref, x_ref, o_ref, map_ref, shift_ref, aflat_ref):
    # w_ref:     SMEM (98,)          conv weight, flattened [cin, ky, kx] (cin 0=avg, 1=max)
    # b_ref:     SMEM (1,)           conv bias
    # x_ref:     VMEM (C, L)         one image, channels x flattened spatial (lane-dense)
    # o_ref:     VMEM (C, L)         output (lane-dense)
    # map_ref:   VMEM (2, Hp, Wp)    scratch: zero-padded [avg, max] planes (2-D)
    # shift_ref: VMEM (2, K, Hp, W)  scratch: kx-shifted copies of the padded planes
    # aflat_ref: VMEM (1, L)         scratch: flattened attention map
    C, L = x_ref.shape
    Hp, Wp = map_ref.shape[1], map_ref.shape[2]
    H, W = Hp - 2 * _P, Wp - 2 * _P

    # ---- Stage 1: fused channel mean + max, one lane-dense pass over C --------------
    row0 = x_ref[pl.ds(0, 1), :].astype(jnp.float32)                      # (1, L)

    def _acc_c(c, carry):
        s, m = carry
        row = x_ref[pl.ds(c, 1), :].astype(jnp.float32)
        return s + row, jnp.maximum(m, row)

    csum, cmax = lax.fori_loop(1, C, _acc_c, (row0, row0))
    cavg = csum * (1.0 / C)                                               # (1, L)

    # ---- Stage 2: build the zero-padded 2-channel map in VMEM -----------------------
    # Border zeroing + interior write reproduces the conv's zero padding exactly.
    map_ref[...] = jnp.zeros_like(map_ref)
    for i in range(H):                 # small per-row relayout: flat (1,L) -> 2-D interior
        sl = slice(i * W, (i + 1) * W)
        map_ref[0, _P + i:_P + i + 1, _P:_P + W] = cavg[:, sl]
        map_ref[1, _P + i:_P + i + 1, _P:_P + W] = cmax[:, sl]

    # ---- Stage 3: hoist the 7 kx lane-shifts out of the tap loop --------------------
    for kx in range(_K):               # 7 lane shifts per plane (instead of 98)
        shift_ref[0, kx] = map_ref[0, :, kx:kx + W]
        shift_ref[1, kx] = map_ref[1, :, kx:kx + W]

    # ---- Stage 4: 7x7 conv; fori over ky bounds live tap slices ---------------------
    def _conv_ky(ky, acc):
        for kx in range(_K):           # 7 static inner taps: sublane-offset loads + VPU MACs
            w_a = w_ref[ky * _K + kx]
            w_m = w_ref[_KK + ky * _K + kx]
            a_tap = shift_ref[0, kx, pl.ds(ky, H), :]
            m_tap = shift_ref[1, kx, pl.ds(ky, H), :]
            acc = acc + w_a * a_tap + w_m * m_tap
        return acc

    acc0 = jnp.full((H, W), b_ref[0], dtype=jnp.float32)
    acc = lax.fori_loop(0, _K, _conv_ky, acc0)                            # (H, W)

    # ---- Stage 5: sigmoid via tanh (exact; tanh runs on the EUP slot) ---------------
    attn2d = 0.5 * (jnp.tanh(0.5 * acc) + 1.0)                            # (H, W)

    # ---- Stage 6: flatten attn, then lane-dense broadcast multiply + store ----------
    for i in range(H):                 # small per-row relayout: 2-D -> flat (1, L)
        aflat_ref[:, i * W:(i + 1) * W] = attn2d[i:i + 1, :]
    attn_flat = aflat_ref[...]                                            # (1, L)

    def _mul_c(c, carry):
        xrow = x_ref[pl.ds(c, 1), :].astype(jnp.float32)
        o_ref[pl.ds(c, 1), :] = (xrow * attn_flat).astype(o_ref.dtype)
        return carry

    lax.fori_loop(0, C, _mul_c, 0)


@jax.jit
def spatial_attention_forward(x_nchw, weight, bias):
    """x_nchw: (N, C, H, W); weight: (1, 2, 7, 7); bias: (1,) -> (N, C, H, W)."""
    N, C, H, W = x_nchw.shape
    L = H * W
    Hp, Wp = H + 2 * _P, W + 2 * _P

    # No pad, no dtype copy: x is read exactly once from HBM.  The (N, C, H*W)
    # reshape is metadata-only and makes all bulk loads/stores lane-dense.
    x_flat = x_nchw.reshape(N, C, L)
    w_flat = weight.reshape(-1).astype(jnp.float32)        # (98,) = [avg taps | max taps]
    b = bias.reshape(1).astype(jnp.float32)                # (1,)

    cost = pl.CostEstimate(
        flops=int(N * (2 * C * L            # channel sum + max
                       + 4 * _KK * L        # conv MACs (2 planes x mul+add)
                       + 4 * L              # sigmoid arithmetic
                       + C * L)),           # broadcast multiply
        transcendentals=int(N * L),         # tanh in sigmoid
        bytes_accessed=int(2 * N * C * L * x_nchw.dtype.itemsize + 4 * (2 * _KK + 1)),
    )

    # Per-step VMEM footprint: double-buffered in+out blocks + scratches; cap at
    # 48 MiB so the same kernel is safe on v7x's 64 MiB VMEM.
    block_bytes = 2 * 2 * C * L * x_nchw.dtype.itemsize
    scratch_bytes = 4 * (2 * Hp * Wp + 2 * _K * Hp * W + L)
    vmem_limit = int(min(48 * 1024 * 1024,
                         max(8 * 1024 * 1024, 4 * (block_bytes + scratch_bytes))))

    out_flat = pl.pallas_call(
        _spatial_attn_kernel,
        out_shape=jax.ShapeDtypeStruct((N, C, L), x_nchw.dtype),
        grid=(N,),
        in_specs=[
            pl.BlockSpec(memory_space=pltpu.MemorySpace.SMEM),     # conv weight (98,)
            pl.BlockSpec(memory_space=pltpu.MemorySpace.SMEM),     # conv bias   (1,)
            pl.BlockSpec((None, C, L), lambda n: (n, 0, 0)),       # x, lane-dense
        ],
        out_specs=pl.BlockSpec((None, C, L), lambda n: (n, 0, 0)),
        scratch_shapes=[
            pltpu.VMEM((2, Hp, Wp), jnp.float32),                  # padded [avg, max] planes
            pltpu.VMEM((2, _K, Hp, W), jnp.float32),               # kx-shifted plane copies
            pltpu.VMEM((1, L), jnp.float32),                       # flattened attention map
        ],
        compiler_params=pltpu.CompilerParams(
            dimension_semantics=("parallel",),
            vmem_limit_bytes=vmem_limit),
        cost_estimate=cost,
    )(w_flat, b, x_flat)
    return out_flat.reshape(N, C, H, W)


def _reference(x, weight, bias):
    """Pure-JAX replica of the PyTorch SpatialAttention forward."""
    avg = jnp.mean(x, axis=1, keepdims=True)
    mx = jnp.max(x, axis=1, keepdims=True)
    m = jnp.concatenate([avg, mx], axis=1)                          # (N, 2, H, W)
    y = jax.lax.conv_general_dilated(
        m.astype(jnp.float32), weight.astype(jnp.float32),
        window_strides=(1, 1), padding=((_P, _P), (_P, _P)),
        dimension_numbers=("NCHW", "OIHW", "NCHW"))
    y = y + bias[None, :, None, None]
    attn = jax.nn.sigmoid(y)
    return x * attn


if __name__ == "__main__":
    key = jax.random.PRNGKey(0)
    k_x, k_w, k_b = jax.random.split(key, 3)

    N, C, H, W = 2, 4, 16, 16
    x = jax.random.normal(k_x, (N, C, H, W), dtype=jnp.float32)
    weight = jax.random.normal(k_w, (1, 2, _K, _K), dtype=jnp.float32) * 0.1
    bias = jax.random.normal(k_b, (1,), dtype=jnp.float32) * 0.1

    out = spatial_attention_forward(x, weight, bias)
    out = jax.block_until_ready(out)

    ref = _reference(x, weight, bias)
    assert out.shape == (N, C, H, W), out.shape
    assert jnp.allclose(out, ref, atol=1e-4, rtol=1e-4), \
        float(jnp.max(jnp.abs(out - ref)))

    print("KERNEL_OK")
</pallas_src>

<mosaic_0001>
module attributes {stable_mosaic.version = 11 : i64} {
  func.func @_spatial_attn_kernel(%arg0: i32, %arg1: memref<98xf32, #tpu.memory_space<smem>>, %arg2: memref<1xf32, #tpu.memory_space<smem>>, %arg3: memref<1x4x256xf32, #tpu.memory_space<vmem>>, %arg4: memref<1x4x256xf32, #tpu.memory_space<vmem>>, %arg5: memref<2x22x22xf32, #tpu.memory_space<vmem>>, %arg6: memref<2x7x22x16xf32, #tpu.memory_space<vmem>>, %arg7: memref<1x256xf32, #tpu.memory_space<vmem>>) attributes {dimension_semantics = [#tpu.dimension_semantics<parallel>], iteration_bounds = array<i64: 2>, scalar_prefetch = 0 : i64, scratch_operands = 3 : i64, tpu.core_type = #tpu.core_type<tc>, window_params = [{transform_indices = @transform_0, window_bounds = array<i64: 98>}, {transform_indices = @transform_1, window_bounds = array<i64: 1>}, {transform_indices = @transform_2, window_bounds = array<i64: 1, 4, 256>}, {transform_indices = @transform_3, window_bounds = array<i64: 1, 4, 256>}]} {
    %c0 = arith.constant 0 : index
    %c0_0 = arith.constant 0 : index
    %c0_1 = arith.constant 0 : index
    %0 = vector.load %arg3[%c0, %c0_0, %c0_1] : memref<1x4x256xf32, #tpu.memory_space<vmem>>, vector<1x1x256xf32>
    %1 = vector.shape_cast %0 : vector<1x1x256xf32> to vector<1x256xf32>
    %c1_i32 = arith.constant 1 : i32
    %c3_i32 = arith.constant 3 : i32
    %2 = arith.addi %c1_i32, %c3_i32 : i32
    %c1_i32_2 = arith.constant 1 : i32
    %3:2 = scf.for %arg8 = %c1_i32 to %2 step %c1_i32_2 iter_args(%arg9 = %1, %arg10 = %1) -> (vector<1x256xf32>, vector<1x256xf32>)  : i32 {
      %c0_213 = arith.constant 0 : index
      %251 = arith.index_cast %arg8 : i32 to index
      %c0_214 = arith.constant 0 : index
      %252 = vector.load %arg3[%c0_213, %251, %c0_214] : memref<1x4x256xf32, #tpu.memory_space<vmem>>, vector<1x1x256xf32>
      %253 = vector.shape_cast %252 : vector<1x1x256xf32> to vector<1x256xf32>
      %254 = arith.addf %arg9, %253 : vector<1x256xf32>
      %255 = arith.maximumf %arg10, %253 : vector<1x256xf32>
      scf.yield %254, %255 : vector<1x256xf32>, vector<1x256xf32>
    }
    %c3_i32_3 = arith.constant 3 : i32
    %cst = arith.constant 2.500000e-01 : f32
    %4 = vector.broadcast %cst : f32 to vector<1x256xf32>
    %5 = arith.mulf %3#0, %4 : vector<1x256xf32>
    %cst_4 = arith.constant 0.000000e+00 : f32
    %6 = vector.broadcast %cst_4 : f32 to vector<2x22x22xf32>
    %c0_5 = arith.constant 0 : index
    %c0_6 = arith.constant 0 : index
    %c0_7 = arith.constant 0 : index
    %7 = vector.load %arg5[%c0_5, %c0_6, %c0_7] : memref<2x22x22xf32, #tpu.memory_space<vmem>>, vector<2x22x22xf32>
    tpu.vector_store %arg5[%c0_5, %c0_6, %c0_7], %6 {strides = array<i32>} : memref<2x22x22xf32, #tpu.memory_space<vmem>>, vector<2x22x22xf32>,
    %8 = vector.extract_strided_slice %5 {offsets = [0, 0], sizes = [1, 16], strides = [1, 1]} : vector<1x256xf32> to vector<1x16xf32>
    %c0_8 = arith.constant 0 : index
    %c3 = arith.constant 3 : index
    %c3_9 = arith.constant 3 : index
    %9 = vector.load %arg5[%c0_8, %c3, %c3_9] : memref<2x22x22xf32, #tpu.memory_space<vmem>>, vector<1x1x16xf32>
    %10 = vector.shape_cast %9 : vector<1x1x16xf32> to vector<1x16xf32>
    %11 = vector.shape_cast %8 : vector<1x16xf32> to vector<1x1x16xf32>
    tpu.vector_store %arg5[%c0_8, %c3, %c3_9], %11 {strides = array<i32>} : memref<2x22x22xf32, #tpu.memory_space<vmem>>, vector<1x1x16xf32>,
    %12 = vector.extract_strided_slice %3#1 {offsets = [0, 0], sizes = [1, 16], strides = [1, 1]} : vector<1x256xf32> to vector<1x16xf32>
    %c1 = arith.constant 1 : index
    %c3_10 = arith.constant 3 : index
    %c3_11 = arith.constant 3 : index
    %13 = vector.load %arg5[%c1, %c3_10, %c3_11] : memref<2x22x22xf32, #tpu.memory_space<vmem>>, vector<1x1x16xf32>
    %14 = vector.shape_cast %13 : vector<1x1x16xf32> to vector<1x16xf32>
    %15 = vector.shape_cast %12 : vector<1x16xf32> to vector<1x1x16xf32>
    tpu.vector_store %arg5[%c1, %c3_10, %c3_11], %15 {strides = array<i32>} : memref<2x22x22xf32, #tpu.memory_space<vmem>>, vector<1x1x16xf32>,
    %16 = vector.extract_strided_slice %5 {offsets = [0, 16], sizes = [1, 16], strides = [1, 1]} : vector<1x256xf32> to vector<1x16xf32>
    %c0_12 = arith.constant 0 : index
    %c4 = arith.constant 4 : index
    %c3_13 = arith.constant 3 : index
    %17 = vector.load %arg5[%c0_12, %c4, %c3_13] : memref<2x22x22xf32, #tpu.memory_space<vmem>>, vector<1x1x16xf32>
    %18 = vector.shape_cast %17 : vector<1x1x16xf32> to vector<1x16xf32>
    %19 = vector.shape_cast %16 : vector<1x16xf32> to vector<1x1x16xf32>
    tpu.vector_store %arg5[%c0_12, %c4, %c3_13], %19 {strides = array<i32>} : memref<2x22x22xf32, #tpu.memory_space<vmem>>, vector<1x1x16xf32>,
    %20 = vector.extract_strided_slice %3#1 {offsets = [0, 16], sizes = [1, 16], strides = [1, 1]} : vector<1x256xf32> to vector<1x16xf32>
    %c1_14 = arith.constant 1 : index
    %c4_15 = arith.constant 4 : index
    %c3_16 = arith.constant 3 : index
    %21 = vector.load %arg5[%c1_14, %c4_15, %c3_16] : memref<2x22x22xf32, #tpu.memory_space<vmem>>, vector<1x1x16xf32>
    %22 = vector.shape_cast %21 : vector<1x1x16xf32> to vector<1x16xf32>
    %23 = vector.shape_cast %20 : vector<1x16xf32> to vector<1x1x16xf32>
    tpu.vector_store %arg5[%c1_14, %c4_15, %c3_16], %23 {strides = array<i32>} : memref<2x22x22xf32, #tpu.memory_space<vmem>>, vector<1x1x16xf32>,
    %24 = vector.extract_strided_slice %5 {offsets = [0, 32], sizes = [1, 16], strides = [1, 1]} : vector<1x256xf32> to vector<1x16xf32>
    %c0_17 = arith.constant 0 : index
    %c5 = arith.constant 5 : index
    %c3_18 = arith.constant 3 : index
    %25 = vector.load %arg5[%c0_17, %c5, %c3_18] : memref<2x22x22xf32, #tpu.memory_space<vmem>>, vector<1x1x16xf32>
    %26 = vector.shape_cast %25 : vector<1x1x16xf32> to vector<1x16xf32>
    %27 = vector.shape_cast %24 : vector<1x16xf32> to vector<1x1x16xf32>
    tpu.vector_store %arg5[%c0_17, %c5, %c3_18], %27 {strides = array<i32>} : memref<2x22x22xf32, #tpu.memory_space<vmem>>, vector<1x1x16xf32>,
    %28 = vector.extract_strided_slice %3#1 {offsets = [0, 32], sizes = [1, 16], strides = [1, 1]} : vector<1x256xf32> to vector<1x16xf32>
    %c1_19 = arith.constant 1 : index
    %c5_20 = arith.constant 5 : index
    %c3_21 = arith.constant 3 : index
    %29 = vector.load %arg5[%c1_19, %c5_20, %c3_21] : memref<2x22x22xf32, #tpu.memory_space<vmem>>, vector<1x1x16xf32>
    %30 = vector.shape_cast %29 : vector<1x1x16xf32> to vector<1x16xf32>
    %31 = vector.shape_cast %28 : vector<1x16xf32> to vector<1x1x16xf32>
    tpu.vector_store %arg5[%c1_19, %c5_20, %c3_21], %31 {strides = array<i32>} : memref<2x22x22xf32, #tpu.memory_space<vmem>>, vector<1x1x16xf32>,
    %32 = vector.extract_strided_slice %5 {offsets = [0, 48], sizes = [1, 16], strides = [1, 1]} : vector<1x256xf32> to vector<1x16xf32>
    %c0_22 = arith.constant 0 : index
    %c6 = arith.constant 6 : index
    %c3_23 = arith.constant 3 : index
    %33 = vector.load %arg5[%c0_22, %c6, %c3_23] : memref<2x22x22xf32, #tpu.memory_space<vmem>>, vector<1x1x16xf32>
    %34 = vector.shape_cast %33 : vector<1x1x16xf32> to vector<1x16xf32>
    %35 = vector.shape_cast %32 : vector<1x16xf32> to vector<1x1x16xf32>
    tpu.vector_store %arg5[%c0_22, %c6, %c3_23], %35 {strides = array<i32>} : memref<2x22x22xf32, #tpu.memory_space<vmem>>, vector<1x1x16xf32>,
    %36 = vector.extract_strided_slice %3#1 {offsets = [0, 48], sizes = [1, 16], strides = [1, 1]} : vector<1x256xf32> to vector<1x16xf32>
    %c1_24 = arith.constant 1 : index
    %c6_25 = arith.constant 6 : index
    %c3_26 = arith.constant 3 : index
    %37 = vector.load %arg5[%c1_24, %c6_25, %c3_26] : memref<2x22x22xf32, #tpu.memory_space<vmem>>, vector<1x1x16xf32>
    %38 = vector.shape_cast %37 : vector<1x1x16xf32> to vector<1x16xf32>
    %39 = vector.shape_cast %36 : vector<1x16xf32> to vector<1x1x16xf32>
    tpu.vector_store %arg5[%c1_24, %c6_25, %c3_26], %39 {strides = array<i32>} : memref<2x22x22xf32, #tpu.memory_space<vmem>>, vector<1x1x16xf32>,
    %40 = vector.extract_strided_slice %5 {offsets = [0, 64], sizes = [1, 16], strides = [1, 1]} : vector<1x256xf32> to vector<1x16xf32>
    %c0_27 = arith.constant 0 : index
    %c7 = arith.constant 7 : index
    %c3_28 = arith.constant 3 : index
    %41 = vector.load %arg5[%c0_27, %c7, %c3_28] : memref<2x22x22xf32, #tpu.memory_space<vmem>>, vector<1x1x16xf32>
    %42 = vector.shape_cast %41 : vector<1x1x16xf32> to vector<1x16xf32>
    %43 = vector.shape_cast %40 : vector<1x16xf32> to vector<1x1x16xf32>
    tpu.vector_store %arg5[%c0_27, %c7, %c3_28], %43 {strides = array<i32>} : memref<2x22x22xf32, #tpu.memory_space<vmem>>, vector<1x1x16xf32>,
    %44 = vector.extract_strided_slice %3#1 {offsets = [0, 64], sizes = [1, 16], strides = [1, 1]} : vector<1x256xf32> to vector<1x16xf32>
    %c1_29 = arith.constant 1 : index
    %c7_30 = arith.constant 7 : index
    %c3_31 = arith.constant 3 : index
    %45 = vector.load %arg5[%c1_29, %c7_30, %c3_31] : memref<2x22x22xf32, #tpu.memory_space<vmem>>, vector<1x1x16xf32>
    %46 = vector.shape_cast %45 : vector<1x1x16xf32> to vector<1x16xf32>
    %47 = vector.shape_cast %44 : vector<1x16xf32> to vector<1x1x16xf32>
    tpu.vector_store %arg5[%c1_29, %c7_30, %c3_31], %47 {strides = array<i32>} : memref<2x22x22xf32, #tpu.memory_space<vmem>>, vector<1x1x16xf32>,
    %48 = vector.extract_strided_slice %5 {offsets = [0, 80], sizes = [1, 16], strides = [1, 1]} : vector<1x256xf32> to vector<1x16xf32>
    %c0_32 = arith.constant 0 : index
    %c8 = arith.constant 8 : index
    %c3_33 = arith.constant 3 : index
    %49 = vector.load %arg5[%c0_32, %c8, %c3_33] : memref<2x22x22xf32, #tpu.memory_space<vmem>>, vector<1x1x16xf32>
    %50 = vector.shape_cast %49 : vector<1x1x16xf32> to vector<1x16xf32>
    %51 = vector.shape_cast %48 : vector<1x16xf32> to vector<1x1x16xf32>
    tpu.vector_store %arg5[%c0_32, %c8, %c3_33], %51 {strides = array<i32>} : memref<2x22x22xf32, #tpu.memory_space<vmem>>, vector<1x1x16xf32>,
    %52 = vector.extract_strided_slice %3#1 {offsets = [0, 80], sizes = [1, 16], strides = [1, 1]} : vector<1x256xf32> to vector<1x16xf32>
    %c1_34 = arith.constant 1 : index
    %c8_35 = arith.constant 8 : index
    %c3_36 = arith.constant 3 : index
    %53 = vector.load %arg5[%c1_34, %c8_35, %c3_36] : memref<2x22x22xf32, #tpu.memory_space<vmem>>, vector<1x1x16xf32>
    %54 = vector.shape_cast %53 : vector<1x1x16xf32> to vector<1x16xf32>
    %55 = vector.shape_cast %52 : vector<1x16xf32> to vector<1x1x16xf32>
    tpu.vector_store %arg5[%c1_34, %c8_35, %c3_36], %55 {strides = array<i32>} : memref<2x22x22xf32, #tpu.memory_space<vmem>>, vector<1x1x16xf32>,
    %56 = vector.extract_strided_slice %5 {offsets = [0, 96], sizes = [1, 16], strides = [1, 1]} : vector<1x256xf32> to vector<1x16xf32>
    %c0_37 = arith.constant 0 : index
    %c9 = arith.constant 9 : index
    %c3_38 = arith.constant 3 : index
    %57 = vector.load %arg5[%c0_37, %c9, %c3_38] : memref<2x22x22xf32, #tpu.memory_space<vmem>>, vector<1x1x16xf32>
    %58 = vector.shape_cast %57 : vector<1x1x16xf32> to vector<1x16xf32>
    %59 = vector.shape_cast %56 : vector<1x16xf32> to vector<1x1x16xf32>
    tpu.vector_store %arg5[%c0_37, %c9, %c3_38], %59 {strides = array<i32>} : memref<2x22x22xf32, #tpu.memory_space<vmem>>, vector<1x1x16xf32>,
    %60 = vector.extract_strided_slice %3#1 {offsets = [0, 96], sizes = [1, 16], strides = [1, 1]} : vector<1x256xf32> to vector<1x16xf32>
    %c1_39 = arith.constant 1 : index
    %c9_40 = arith.constant 9 : index
    %c3_41 = arith.constant 3 : index
    %61 = vector.load %arg5[%c1_39, %c9_40, %c3_41] : memref<2x22x22xf32, #tpu.memory_space<vmem>>, vector<1x1x16xf32>
    %62 = vector.shape_cast %61 : vector<1x1x16xf32> to vector<1x16xf32>
    %63 = vector.shape_cast %60 : vector<1x16xf32> to vector<1x1x16xf32>
    tpu.vector_store %arg5[%c1_39, %c9_40, %c3_41], %63 {strides = array<i32>} : memref<2x22x22xf32, #tpu.memory_space<vmem>>, vector<1x1x16xf32>,
    %64 = vector.extract_strided_slice %5 {offsets = [0, 112], sizes = [1, 16], strides = [1, 1]} : vector<1x256xf32> to vector<1x16xf32>
    %c0_42 = arith.constant 0 : index
    %c10 = arith.constant 10 : index
    %c3_43 = arith.constant 3 : index
    %65 = vector.load %arg5[%c0_42, %c10, %c3_43] : memref<2x22x22xf32, #tpu.memory_space<vmem>>, vector<1x1x16xf32>
    %66 = vector.shape_cast %65 : vector<1x1x16xf32> to vector<1x16xf32>
    %67 = vector.shape_cast %64 : vector<1x16xf32> to vector<1x1x16xf32>
    tpu.vector_store %arg5[%c0_42, %c10, %c3_43], %67 {strides = array<i32>} : memref<2x22x22xf32, #tpu.memory_space<vmem>>, vector<1x1x16xf32>,
    %68 = vector.extract_strided_slice %3#1 {offsets = [0, 112], sizes = [1, 16], strides = [1, 1]} : vector<1x256xf32> to vector<1x16xf32>
    %c1_44 = arith.constant 1 : index
    %c10_45 = arith.constant 10 : index
    %c3_46 = arith.constant 3 : index
    %69 = vector.load %arg5[%c1_44, %c10_45, %c3_46] : memref<2x22x22xf32, #tpu.memory_space<vmem>>, vector<1x1x16xf32>
    %70 = vector.shape_cast %69 : vector<1x1x16xf32> to vector<1x16xf32>
    %71 = vector.shape_cast %68 : vector<1x16xf32> to vector<1x1x16xf32>
    tpu.vector_store %arg5[%c1_44, %c10_45, %c3_46], %71 {strides = array<i32>} : memref<2x22x22xf32, #tpu.memory_space<vmem>>, vector<1x1x16xf32>,
    %72 = vector.extract_strided_slice %5 {offsets = [0, 128], sizes = [1, 16], strides = [1, 1]} : vector<1x256xf32> to vector<1x16xf32>
    %c0_47 = arith.constant 0 : index
    %c11 = arith.constant 11 : index
    %c3_48 = arith.constant 3 : index
    %73 = vector.load %arg5[%c0_47, %c11, %c3_48] : memref<2x22x22xf32, #tpu.memory_space<vmem>>, vector<1x1x16xf32>
    %74 = vector.shape_cast %73 : vector<1x1x16xf32> to vector<1x16xf32>
    %75 = vector.shape_cast %72 : vector<1x16xf32> to vector<1x1x16xf32>
    tpu.vector_store %arg5[%c0_47, %c11, %c3_48], %75 {strides = array<i32>} : memref<2x22x22xf32, #tpu.memory_space<vmem>>, vector<1x1x16xf32>,
    %76 = vector.extract_strided_slice %3#1 {offsets = [0, 128], sizes = [1, 16], strides = [1, 1]} : vector<1x256xf32> to vector<1x16xf32>
    %c1_49 = arith.constant 1 : index
    %c11_50 = arith.constant 11 : index
    %c3_51 = arith.constant 3 : index
    %77 = vector.load %arg5[%c1_49, %c11_50, %c3_51] : memref<2x22x22xf32, #tpu.memory_space<vmem>>, vector<1x1x16xf32>
    %78 = vector.shape_cast %77 : vector<1x1x16xf32> to vector<1x16xf32>
    %79 = vector.shape_cast %76 : vector<1x16xf32> to vector<1x1x16xf32>
    tpu.vector_store %arg5[%c1_49, %c11_50, %c3_51], %79 {strides = array<i32>} : memref<2x22x22xf32, #tpu.memory_space<vmem>>, vector<1x1x16xf32>,
    %80 = vector.extract_strided_slice %5 {offsets = [0, 144], sizes = [1, 16], strides = [1, 1]} : vector<1x256xf32> to vector<1x16xf32>
    %c0_52 = arith.constant 0 : index
    %c12 = arith.constant 12 : index
    %c3_53 = arith.constant 3 : index
    %81 = vector.load %arg5[%c0_52, %c12, %c3_53] : memref<2x22x22xf32, #tpu.memory_space<vmem>>, vector<1x1x16xf32>
    %82 = vector.shape_cast %81 : vector<1x1x16xf32> to vector<1x16xf32>
    %83 = vector.shape_cast %80 : vector<1x16xf32> to vector<1x1x16xf32>
    tpu.vector_store %arg5[%c0_52, %c12, %c3_53], %83 {strides = array<i32>} : memref<2x22x22xf32, #tpu.memory_space<vmem>>, vector<1x1x16xf32>,
    %84 = vector.extract_strided_slice %3#1 {offsets = [0, 144], sizes = [1, 16], strides = [1, 1]} : vector<1x256xf32> to vector<1x16xf32>
    %c1_54 = arith.constant 1 : index
    %c12_55 = arith.constant 12 : index
    %c3_56 = arith.constant 3 : index
    %85 = vector.load %arg5[%c1_54, %c12_55, %c3_56] : memref<2x22x22xf32, #tpu.memory_space<vmem>>, vector<1x1x16xf32>
    %86 = vector.shape_cast %85 : vector<1x1x16xf32> to vector<1x16xf32>
    %87 = vector.shape_cast %84 : vector<1x16xf32> to vector<1x1x16xf32>
    tpu.vector_store %arg5[%c1_54, %c12_55, %c3_56], %87 {strides = array<i32>} : memref<2x22x22xf32, #tpu.memory_space<vmem>>, vector<1x1x16xf32>,
    %88 = vector.extract_strided_slice %5 {offsets = [0, 160], sizes = [1, 16], strides = [1, 1]} : vector<1x256xf32> to vector<1x16xf32>
    %c0_57 = arith.constant 0 : index
    %c13 = arith.constant 13 : index
    %c3_58 = arith.constant 3 : index
    %89 = vector.load %arg5[%c0_57, %c13, %c3_58] : memref<2x22x22xf32, #tpu.memory_space<vmem>>, vector<1x1x16xf32>
    %90 = vector.shape_cast %89 : vector<1x1x16xf32> to vector<1x16xf32>
    %91 = vector.shape_cast %88 : vector<1x16xf32> to vector<1x1x16xf32>
    tpu.vector_store %arg5[%c0_57, %c13, %c3_58], %91 {strides = array<i32>} : memref<2x22x22xf32, #tpu.memory_space<vmem>>, vector<1x1x16xf32>,
    %92 = vector.extract_strided_slice %3#1 {offsets = [0, 160], sizes = [1, 16], strides = [1, 1]} : vector<1x256xf32> to vector<1x16xf32>
    %c1_59 = arith.constant 1 : index
    %c13_60 = arith.constant 13 : index
    %c3_61 = arith.constant 3 : index
    %93 = vector.load %arg5[%c1_59, %c13_60, %c3_61] : memref<2x22x22xf32, #tpu.memory_space<vmem>>, vector<1x1x16xf32>
    %94 = vector.shape_cast %93 : vector<1x1x16xf32> to vector<1x16xf32>
    %95 = vector.shape_cast %92 : vector<1x16xf32> to vector<1x1x16xf32>
    tpu.vector_store %arg5[%c1_59, %c13_60, %c3_61], %95 {strides = array<i32>} : memref<2x22x22xf32, #tpu.memory_space<vmem>>, vector<1x1x16xf32>,
    %96 = vector.extract_strided_slice %5 {offsets = [0, 176], sizes = [1, 16], strides = [1, 1]} : vector<1x256xf32> to vector<1x16xf32>
    %c0_62 = arith.constant 0 : index
    %c14 = arith.constant 14 : index
    %c3_63 = arith.constant 3 : index
    %97 = vector.load %arg5[%c0_62, %c14, %c3_63] : memref<2x22x22xf32, #tpu.memory_space<vmem>>, vector<1x1x16xf32>
    %98 = vector.shape_cast %97 : vector<1x1x16xf32> to vector<1x16xf32>
    %99 = vector.shape_cast %96 : vector<1x16xf32> to vector<1x1x16xf32>
    tpu.vector_store %arg5[%c0_62, %c14, %c3_63], %99 {strides = array<i32>} : memref<2x22x22xf32, #tpu.memory_space<vmem>>, vector<1x1x16xf32>,
    %100 = vector.extract_strided_slice %3#1 {offsets = [0, 176], sizes = [1, 16], strides = [1, 1]} : vector<1x256xf32> to vector<1x16xf32>
    %c1_64 = arith.constant 1 : index
    %c14_65 = arith.constant 14 : index
    %c3_66 = arith.constant 3 : index
    %101 = vector.load %arg5[%c1_64, %c14_65, %c3_66] : memref<2x22x22xf32, #tpu.memory_space<vmem>>, vector<1x1x16xf32>
    %102 = vector.shape_cast %101 : vector<1x1x16xf32> to vector<1x16xf32>
    %103 = vector.shape_cast %100 : vector<1x16xf32> to vector<1x1x16xf32>
    tpu.vector_store %arg5[%c1_64, %c14_65, %c3_66], %103 {strides = array<i32>} : memref<2x22x22xf32, #tpu.memory_space<vmem>>, vector<1x1x16xf32>,
    %104 = vector.extract_strided_slice %5 {offsets = [0, 192], sizes = [1, 16], strides = [1, 1]} : vector<1x256xf32> to vector<1x16xf32>
    %c0_67 = arith.constant 0 : index
    %c15 = arith.constant 15 : index
    %c3_68 = arith.constant 3 : index
    %105 = vector.load %arg5[%c0_67, %c15, %c3_68] : memref<2x22x22xf32, #tpu.memory_space<vmem>>, vector<1x1x16xf32>
    %106 = vector.shape_cast %105 : vector<1x1x16xf32> to vector<1x16xf32>
    %107 = vector.shape_cast %104 : vector<1x16xf32> to vector<1x1x16xf32>
    tpu.vector_store %arg5[%c0_67, %c15, %c3_68], %107 {strides = array<i32>} : memref<2x22x22xf32, #tpu.memory_space<vmem>>, vector<1x1x16xf32>,
    %108 = vector.extract_strided_slice %3#1 {offsets = [0, 192], sizes = [1, 16], strides = [1, 1]} : vector<1x256xf32> to vector<1x16xf32>
    %c1_69 = arith.constant 1 : index
    %c15_70 = arith.constant 15 : index
    %c3_71 = arith.constant 3 : index
    %109 = vector.load %arg5[%c1_69, %c15_70, %c3_71] : memref<2x22x22xf32, #tpu.memory_space<vmem>>, vector<1x1x16xf32>
    %110 = vector.shape_cast %109 : vector<1x1x16xf32> to vector<1x16xf32>
    %111 = vector.shape_cast %108 : vector<1x16xf32> to vector<1x1x16xf32>
    tpu.vector_store %arg5[%c1_69, %c15_70, %c3_71], %111 {strides = array<i32>} : memref<2x22x22xf32, #tpu.memory_space<vmem>>, vector<1x1x16xf32>,
    %112 = vector.extract_strided_slice %5 {offsets = [0, 208], sizes = [1, 16], strides = [1, 1]} : vector<1x256xf32> to vector<1x16xf32>
    %c0_72 = arith.constant 0 : index
    %c16 = arith.constant 16 : index
    %c3_73 = arith.constant 3 : index
    %113 = vector.load %arg5[%c0_72, %c16, %c3_73] : memref<2x22x22xf32, #tpu.memory_space<vmem>>, vector<1x1x16xf32>
    %114 = vector.shape_cast %113 : vector<1x1x16xf32> to vector<1x16xf32>
    %115 = vector.shape_cast %112 : vector<1x16xf32> to vector<1x1x16xf32>
    tpu.vector_store %arg5[%c0_72, %c16, %c3_73], %115 {strides = array<i32>} : memref<2x22x22xf32, #tpu.memory_space<vmem>>, vector<1x1x16xf32>,
    %116 = vector.extract_strided_slice %3#1 {offsets = [0, 208], sizes = [1, 16], strides = [1, 1]} : vector<1x256xf32> to vector<1x16xf32>
    %c1_74 = arith.constant 1 : index
    %c16_75 = arith.constant 16 : index
    %c3_76 = arith.constant 3 : index
    %117 = vector.load %arg5[%c1_74, %c16_75, %c3_76] : memref<2x22x22xf32, #tpu.memory_space<vmem>>, vector<1x1x16xf32>
    %118 = vector.shape_cast %117 : vector<1x1x16xf32> to vector<1x16xf32>
    %119 = vector.shape_cast %116 : vector<1x16xf32> to vector<1x1x16xf32>
    tpu.vector_store %arg5[%c1_74, %c16_75, %c3_76], %119 {strides = array<i32>} : memref<2x22x22xf32, #tpu.memory_space<vmem>>, vector<1x1x16xf32>,
    %120 = vector.extract_strided_slice %5 {offsets = [0, 224], sizes = [1, 16], strides = [1, 1]} : vector<1x256xf32> to vector<1x16xf32>
    %c0_77 = arith.constant 0 : index
    %c17 = arith.constant 17 : index
    %c3_78 = arith.constant 3 : index
    %121 = vector.load %arg5[%c0_77, %c17, %c3_78] : memref<2x22x22xf32, #tpu.memory_space<vmem>>, vector<1x1x16xf32>
    %122 = vector.shape_cast %121 : vector<1x1x16xf32> to vector<1x16xf32>
    %123 = vector.shape_cast %120 : vector<1x16xf32> to vector<1x1x16xf32>
    tpu.vector_store %arg5[%c0_77, %c17, %c3_78], %123 {strides = array<i32>} : memref<2x22x22xf32, #tpu.memory_space<vmem>>, vector<1x1x16xf32>,
    %124 = vector.extract_strided_slice %3#1 {offsets = [0, 224], sizes = [1, 16], strides = [1, 1]} : vector<1x256xf32> to vector<1x16xf32>
    %c1_79 = arith.constant 1 : index
    %c17_80 = arith.constant 17 : index
    %c3_81 = arith.constant 3 : index
    %125 = vector.load %arg5[%c1_79, %c17_80, %c3_81] : memref<2x22x22xf32, #tpu.memory_space<vmem>>, vector<1x1x16xf32>
    %126 = vector.shape_cast %125 : vector<1x1x16xf32> to vector<1x16xf32>
    %127 = vector.shape_cast %124 : vector<1x16xf32> to vector<1x1x16xf32>
    tpu.vector_store %arg5[%c1_79, %c17_80, %c3_81], %127 {strides = array<i32>} : memref<2x22x22xf32, #tpu.memory_space<vmem>>, vector<1x1x16xf32>,
    %128 = vector.extract_strided_slice %5 {offsets = [0, 240], sizes = [1, 16], strides = [1, 1]} : vector<1x256xf32> to vector<1x16xf32>
    %c0_82 = arith.constant 0 : index
    %c18 = arith.constant 18 : index
    %c3_83 = arith.constant 3 : index
    %129 = vector.load %arg5[%c0_82, %c18, %c3_83] : memref<2x22x22xf32, #tpu.memory_space<vmem>>, vector<1x1x16xf32>
    %130 = vector.shape_cast %129 : vector<1x1x16xf32> to vector<1x16xf32>
    %131 = vector.shape_cast %128 : vector<1x16xf32> to vector<1x1x16xf32>
    tpu.vector_store %arg5[%c0_82, %c18, %c3_83], %131 {strides = array<i32>} : memref<2x22x22xf32, #tpu.memory_space<vmem>>, vector<1x1x16xf32>,
    %132 = vector.extract_strided_slice %3#1 {offsets = [0, 240], sizes = [1, 16], strides = [1, 1]} : vector<1x256xf32> to vector<1x16xf32>
    %c1_84 = arith.constant 1 : index
    %c18_85 = arith.constant 18 : index
    %c3_86 = arith.constant 3 : index
    %133 = vector.load %arg5[%c1_84, %c18_85, %c3_86] : memref<2x22x22xf32, #tpu.memory_space<vmem>>, vector<1x1x16xf32>
    %134 = vector.shape_cast %133 : vector<1x1x16xf32> to vector<1x16xf32>
    %135 = vector.shape_cast %132 : vector<1x16xf32> to vector<1x1x16xf32>
    tpu.vector_store %arg5[%c1_84, %c18_85, %c3_86], %135 {strides = array<i32>} : memref<2x22x22xf32, #tpu.memory_space<vmem>>, vector<1x1x16xf32>,
    %c0_87 = arith.constant 0 : index
    %c0_88 = arith.constant 0 : index
    %c0_89 = arith.constant 0 : index
    %136 = vector.load %arg5[%c0_87, %c0_88, %c0_89] : memref<2x22x22xf32, #tpu.memory_space<vmem>>, vector<1x22x16xf32>
    %137 = vector.shape_cast %136 : vector<1x22x16xf32> to vector<22x16xf32>
    %c0_90 = arith.constant 0 : index
    %c0_91 = arith.constant 0 : index
    %c0_92 = arith.constant 0 : index
    %c0_93 = arith.constant 0 : index
    %138 = vector.load %arg6[%c0_90, %c0_91, %c0_92, %c0_93] : memref<2x7x22x16xf32, #tpu.memory_space<vmem>>, vector<1x1x22x16xf32>
    %139 = vector.shape_cast %138 : vector<1x1x22x16xf32> to vector<22x16xf32>
    %140 = vector.shape_cast %137 : vector<22x16xf32> to vector<1x1x22x16xf32>
    tpu.vector_store %arg6[%c0_90, %c0_91, %c0_92, %c0_93], %140 {strides = array<i32>} : memref<2x7x22x16xf32, #tpu.memory_space<vmem>>, vector<1x1x22x16xf32>,
    %c1_94 = arith.constant 1 : index
    %c0_95 = arith.constant 0 : index
    %c0_96 = arith.constant 0 : index
    %141 = vector.load %arg5[%c1_94, %c0_95, %c0_96] : memref<2x22x22xf32, #tpu.memory_space<vmem>>, vector<1x22x16xf32>
    %142 = vector.shape_cast %141 : vector<1x22x16xf32> to vector<22x16xf32>
    %c1_97 = arith.constant 1 : index
    %c0_98 = arith.constant 0 : index
    %c0_99 = arith.constant 0 : index
    %c0_100 = arith.constant 0 : index
    %143 = vector.load %arg6[%c1_97, %c0_98, %c0_99, %c0_100] : memref<2x7x22x16xf32, #tpu.memory_space<vmem>>, vector<1x1x22x16xf32>
    %144 = vector.shape_cast %143 : vector<1x1x22x16xf32> to vector<22x16xf32>
    %145 = vector.shape_cast %142 : vector<22x16xf32> to vector<1x1x22x16xf32>
    tpu.vector_store %arg6[%c1_97, %c0_98, %c0_99, %c0_100], %145 {strides = array<i32>} : memref<2x7x22x16xf32, #tpu.memory_space<vmem>>, vector<1x1x22x16xf32>,
    %c0_101 = arith.constant 0 : index
    %c0_102 = arith.constant 0 : index
    %c1_103 = arith.constant 1 : index
    %146 = vector.load %arg5[%c0_101, %c0_102, %c1_103] : memref<2x22x22xf32, #tpu.memory_space<vmem>>, vector<1x22x16xf32>
    %147 = vector.shape_cast %146 : vector<1x22x16xf32> to vector<22x16xf32>
    %c0_104 = arith.constant 0 : index
    %c1_105 = arith.constant 1 : index
    %c0_106 = arith.constant 0 : index
    %c0_107 = arith.constant 0 : index
    %148 = vector.load %arg6[%c0_104, %c1_105, %c0_106, %c0_107] : memref<2x7x22x16xf32, #tpu.memory_space<vmem>>, vector<1x1x22x16xf32>
    %149 = vector.shape_cast %148 : vector<1x1x22x16xf32> to vector<22x16xf32>
    %150 = vector.shape_cast %147 : vector<22x16xf32> to vector<1x1x22x16xf32>
    tpu.vector_store %arg6[%c0_104, %c1_105, %c0_106, %c0_107], %150 {strides = array<i32>} : memref<2x7x22x16xf32, #tpu.memory_space<vmem>>, vector<1x1x22x16xf32>,
    %c1_108 = arith.constant 1 : index
    %c0_109 = arith.constant 0 : index
    %c1_110 = arith.constant 1 : index
    %151 = vector.load %arg5[%c1_108, %c0_109, %c1_110] : memref<2x22x22xf32, #tpu.memory_space<vmem>>, vector<1x22x16xf32>
    %152 = vector.shape_cast %151 : vector<1x22x16xf32> to vector<22x16xf32>
    %c1_111 = arith.constant 1 : index
    %c1_112 = arith.constant 1 : index
    %c0_113 = arith.constant 0 : index
    %c0_114 = arith.constant 0 : index
    %153 = vector.load %arg6[%c1_111, %c1_112, %c0_113, %c0_114] : memref<2x7x22x16xf32, #tpu.memory_space<vmem>>, vector<1x1x22x16xf32>
    %154 = vector.shape_cast %153 : vector<1x1x22x16xf32> to vector<22x16xf32>
    %155 = vector.shape_cast %152 : vector<22x16xf32> to vector<1x1x22x16xf32>
    tpu.vector_store %arg6[%c1_111, %c1_112, %c0_113, %c0_114], %155 {strides = array<i32>} : memref<2x7x22x16xf32, #tpu.memory_space<vmem>>, vector<1x1x22x16xf32>,
    %c0_115 = arith.constant 0 : index
    %c0_116 = arith.constant 0 : index
    %c2 = arith.constant 2 : index
    %156 = vector.load %arg5[%c0_115, %c0_116, %c2] : memref<2x22x22xf32, #tpu.memory_space<vmem>>, vector<1x22x16xf32>
    %157 = vector.shape_cast %156 : vector<1x22x16xf32> to vector<22x16xf32>
    %c0_117 = arith.constant 0 : index
    %c2_118 = arith.constant 2 : index
    %c0_119 = arith.constant 0 : index
    %c0_120 = arith.constant 0 : index
    %158 = vector.load %arg6[%c0_117, %c2_118, %c0_119, %c0_120] : memref<2x7x22x16xf32, #tpu.memory_space<vmem>>, vector<1x1x22x16xf32>
    %159 = vector.shape_cast %158 : vector<1x1x22x16xf32> to vector<22x16xf32>
    %160 = vector.shape_cast %157 : vector<22x16xf32> to vector<1x1x22x16xf32>
    tpu.vector_store %arg6[%c0_117, %c2_118, %c0_119, %c0_120], %160 {strides = array<i32>} : memref<2x7x22x16xf32, #tpu.memory_space<vmem>>, vector<1x1x22x16xf32>,
    %c1_121 = arith.constant 1 : index
    %c0_122 = arith.constant 0 : index
    %c2_123 = arith.constant 2 : index
    %161 = vector.load %arg5[%c1_121, %c0_122, %c2_123] : memref<2x22x22xf32, #tpu.memory_space<vmem>>, vector<1x22x16xf32>
    %162 = vector.shape_cast %161 : vector<1x22x16xf32> to vector<22x16xf32>
    %c1_124 = arith.constant 1 : index
    %c2_125 = arith.constant 2 : index
    %c0_126 = arith.constant 0 : index
    %c0_127 = arith.constant 0 : index
    %163 = vector.load %arg6[%c1_124, %c2_125, %c0_126, %c0_127] : memref<2x7x22x16xf32, #tpu.memory_space<vmem>>, vector<1x1x22x16xf32>
    %164 = vector.shape_cast %163 : vector<1x1x22x16xf32> to vector<22x16xf32>
    %165 = vector.shape_cast %162 : vector<22x16xf32> to vector<1x1x22x16xf32>
    tpu.vector_store %arg6[%c1_124, %c2_125, %c0_126, %c0_127], %165 {strides = array<i32>} : memref<2x7x22x16xf32, #tpu.memory_space<vmem>>, vector<1x1x22x16xf32>,
    %c0_128 = arith.constant 0 : index
    %c0_129 = arith.constant 0 : index
    %c3_130 = arith.constant 3 : index
    %166 = vector.load %arg5[%c0_128, %c0_129, %c3_130] : memref<2x22x22xf32, #tpu.memory_space<vmem>>, vector<1x22x16xf32>
    %167 = vector.shape_cast %166 : vector<1x22x16xf32> to vector<22x16xf32>
    %c0_131 = arith.constant 0 : index
    %c3_132 = arith.constant 3 : index
    %c0_133 = arith.constant 0 : index
    %c0_134 = arith.constant 0 : index
    %168 = vector.load %arg6[%c0_131, %c3_132, %c0_133, %c0_134] : memref<2x7x22x16xf32, #tpu.memory_space<vmem>>, vector<1x1x22x16xf32>
    %169 = vector.shape_cast %168 : vector<1x1x22x16xf32> to vector<22x16xf32>
    %170 = vector.shape_cast %167 : vector<22x16xf32> to vector<1x1x22x16xf32>
    tpu.vector_store %arg6[%c0_131, %c3_132, %c0_133, %c0_134], %170 {strides = array<i32>} : memref<2x7x22x16xf32, #tpu.memory_space<vmem>>, vector<1x1x22x16xf32>,
    %c1_135 = arith.constant 1 : index
    %c0_136 = arith.constant 0 : index
    %c3_137 = arith.constant 3 : index
    %171 = vector.load %arg5[%c1_135, %c0_136, %c3_137] : memref<2x22x22xf32, #tpu.memory_space<vmem>>, vector<1x22x16xf32>
    %172 = vector.shape_cast %171 : vector<1x22x16xf32> to vector<22x16xf32>
    %c1_138 = arith.constant 1 : index
    %c3_139 = arith.constant 3 : index
    %c0_140 = arith.constant 0 : index
    %c0_141 = arith.constant 0 : index
    %173 = vector.load %arg6[%c1_138, %c3_139, %c0_140, %c0_141] : memref<2x7x22x16xf32, #tpu.memory_space<vmem>>, vector<1x1x22x16xf32>
    %174 = vector.shape_cast %173 : vector<1x1x22x16xf32> to vector<22x16xf32>
    %175 = vector.shape_cast %172 : vector<22x16xf32> to vector<1x1x22x16xf32>
    tpu.vector_store %arg6[%c1_138, %c3_139, %c0_140, %c0_141], %175 {strides = array<i32>} : memref<2x7x22x16xf32, #tpu.memory_space<vmem>>, vector<1x1x22x16xf32>,
    %c0_142 = arith.constant 0 : index
    %c0_143 = arith.constant 0 : index
    %c4_144 = arith.constant 4 : index
    %176 = vector.load %arg5[%c0_142, %c0_143, %c4_144] : memref<2x22x22xf32, #tpu.memory_space<vmem>>, vector<1x22x16xf32>
    %177 = vector.shape_cast %176 : vector<1x22x16xf32> to vector<22x16xf32>
    %c0_145 = arith.constant 0 : index
    %c4_146 = arith.constant 4 : index
    %c0_147 = arith.constant 0 : index
    %c0_148 = arith.constant 0 : index
    %178 = vector.load %arg6[%c0_145, %c4_146, %c0_147, %c0_148] : memref<2x7x22x16xf32, #tpu.memory_space<vmem>>, vector<1x1x22x16xf32>
    %179 = vector.shape_cast %178 : vector<1x1x22x16xf32> to vector<22x16xf32>
    %180 = vector.shape_cast %177 : vector<22x16xf32> to vector<1x1x22x16xf32>
    tpu.vector_store %arg6[%c0_145, %c4_146, %c0_147, %c0_148], %180 {strides = array<i32>} : memref<2x7x22x16xf32, #tpu.memory_space<vmem>>, vector<1x1x22x16xf32>,
    %c1_149 = arith.constant 1 : index
    %c0_150 = arith.constant 0 : index
    %c4_151 = arith.constant 4 : index
    %181 = vector.load %arg5[%c1_149, %c0_150, %c4_151] : memref<2x22x22xf32, #tpu.memory_space<vmem>>, vector<1x22x16xf32>
    %182 = vector.shape_cast %181 : vector<1x22x16xf32> to vector<22x16xf32>
    %c1_152 = arith.constant 1 : index
    %c4_153 = arith.constant 4 : index
    %c0_154 = arith.constant 0 : index
    %c0_155 = arith.constant 0 : index
    %183 = vector.load %arg6[%c1_152, %c4_153, %c0_154, %c0_155] : memref<2x7x22x16xf32, #tpu.memory_space<vmem>>, vector<1x1x22x16xf32>
    %184 = vector.shape_cast %183 : vector<1x1x22x16xf32> to vector<22x16xf32>
    %185 = vector.shape_cast %182 : vector<22x16xf32> to vector<1x1x22x16xf32>
    tpu.vector_store %arg6[%c1_152, %c4_153, %c0_154, %c0_155], %185 {strides = array<i32>} : memref<2x7x22x16xf32, #tpu.memory_space<vmem>>, vector<1x1x22x16xf32>,
    %c0_156 = arith.constant 0 : index
    %c0_157 = arith.constant 0 : index
    %c5_158 = arith.constant 5 : index
    %186 = vector.load %arg5[%c0_156, %c0_157, %c5_158] : memref<2x22x22xf32, #tpu.memory_space<vmem>>, vector<1x22x16xf32>
    %187 = vector.shape_cast %186 : vector<1x22x16xf32> to vector<22x16xf32>
    %c0_159 = arith.constant 0 : index
    %c5_160 = arith.constant 5 : index
    %c0_161 = arith.constant 0 : index
    %c0_162 = arith.constant 0 : index
    %188 = vector.load %arg6[%c0_159, %c5_160, %c0_161, %c0_162] : memref<2x7x22x16xf32, #tpu.memory_space<vmem>>, vector<1x1x22x16xf32>
    %189 = vector.shape_cast %188 : vector<1x1x22x16xf32> to vector<22x16xf32>
    %190 = vector.shape_cast %187 : vector<22x16xf32> to vector<1x1x22x16xf32>
    tpu.vector_store %arg6[%c0_159, %c5_160, %c0_161, %c0_162], %190 {strides = array<i32>} : memref<2x7x22x16xf32, #tpu.memory_space<vmem>>, vector<1x1x22x16xf32>,
    %c1_163 = arith.constant 1 : index
    %c0_164 = arith.constant 0 : index
    %c5_165 = arith.constant 5 : index
    %191 = vector.load %arg5[%c1_163, %c0_164, %c5_165] : memref<2x22x22xf32, #tpu.memory_space<vmem>>, vector<1x22x16xf32>
    %192 = vector.shape_cast %191 : vector<1x22x16xf32> to vector<22x16xf32>
    %c1_166 = arith.constant 1 : index
    %c5_167 = arith.constant 5 : index
    %c0_168 = arith.constant 0 : index
    %c0_169 = arith.constant 0 : index
    %193 = vector.load %arg6[%c1_166, %c5_167, %c0_168, %c0_169] : memref<2x7x22x16xf32, #tpu.memory_space<vmem>>, vector<1x1x22x16xf32>
    %194 = vector.shape_cast %193 : vector<1x1x22x16xf32> to vector<22x16xf32>
    %195 = vector.shape_cast %192 : vector<22x16xf32> to vector<1x1x22x16xf32>
    tpu.vector_store %arg6[%c1_166, %c5_167, %c0_168, %c0_169], %195 {strides = array<i32>} : memref<2x7x22x16xf32, #tpu.memory_space<vmem>>, vector<1x1x22x16xf32>,
    %c0_170 = arith.constant 0 : index
    %c0_171 = arith.constant 0 : index
    %c6_172 = arith.constant 6 : index
    %196 = vector.load %arg5[%c0_170, %c0_171, %c6_172] : memref<2x22x22xf32, #tpu.memory_space<vmem>>, vector<1x22x16xf32>
    %197 = vector.shape_cast %196 : vector<1x22x16xf32> to vector<22x16xf32>
    %c0_173 = arith.constant 0 : index
    %c6_174 = arith.constant 6 : index
    %c0_175 = arith.constant 0 : index
    %c0_176 = arith.constant 0 : index
    %198 = vector.load %arg6[%c0_173, %c6_174, %c0_175, %c0_176] : memref<2x7x22x16xf32, #tpu.memory_space<vmem>>, vector<1x1x22x16xf32>
    %199 = vector.shape_cast %198 : vector<1x1x22x16xf32> to vector<22x16xf32>
    %200 = vector.shape_cast %197 : vector<22x16xf32> to vector<1x1x22x16xf32>
    tpu.vector_store %arg6[%c0_173, %c6_174, %c0_175, %c0_176], %200 {strides = array<i32>} : memref<2x7x22x16xf32, #tpu.memory_space<vmem>>, vector<1x1x22x16xf32>,
    %c1_177 = arith.constant 1 : index
    %c0_178 = arith.constant 0 : index
    %c6_179 = arith.constant 6 : index
    %201 = vector.load %arg5[%c1_177, %c0_178, %c6_179] : memref<2x22x22xf32, #tpu.memory_space<vmem>>, vector<1x22x16xf32>
    %202 = vector.shape_cast %201 : vector<1x22x16xf32> to vector<22x16xf32>
    %c1_180 = arith.constant 1 : index
    %c6_181 = arith.constant 6 : index
    %c0_182 = arith.constant 0 : index
    %c0_183 = arith.constant 0 : index
    %203 = vector.load %arg6[%c1_180, %c6_181, %c0_182, %c0_183] : memref<2x7x22x16xf32, #tpu.memory_space<vmem>>, vector<1x1x22x16xf32>
    %204 = vector.shape_cast %203 : vector<1x1x22x16xf32> to vector<22x16xf32>
    %205 = vector.shape_cast %202 : vector<22x16xf32> to vector<1x1x22x16xf32>
    tpu.vector_store %arg6[%c1_180, %c6_181, %c0_182, %c0_183], %205 {strides = array<i32>} : memref<2x7x22x16xf32, #tpu.memory_space<vmem>>, vector<1x1x22x16xf32>,
    %c0_184 = arith.constant 0 : index
    %206 = memref.load %arg2[%c0_184] : memref<1xf32, #tpu.memory_space<smem>>
    %207 = vector.broadcast %206 : f32 to vector<16x16xf32>
    %c0_i32 = arith.constant 0 : i32
    %c7_i32 = arith.constant 7 : i32
    %208 = arith.addi %c0_i32, %c7_i32 : i32
    %c1_i32_185 = arith.constant 1 : i32
    %209 = scf.for %arg8 = %c0_i32 to %208 step %c1_i32_185 iter_args(%arg9 = %207) -> (vector<16x16xf32>)  : i32 {
      %c7_i32_213 = arith.constant 7 : i32
      %251 = arith.muli %arg8, %c7_i32_213 : i32
      %c0_i32_214 = arith.constant 0 : i32
      %252 = arith.addi %251, %c0_i32_214 : i32
      %253 = arith.index_cast %252 : i32 to index
      %254 = memref.load %arg1[%253] : memref<98xf32, #tpu.memory_space<smem>>
      %c7_i32_215 = arith.constant 7 : i32
      %255 = arith.muli %arg8, %c7_i32_215 : i32
      %c49_i32 = arith.constant 49 : i32
      %256 = arith.addi %c49_i32, %255 : i32
      %c0_i32_216 = arith.constant 0 : i32
      %257 = arith.addi %256, %c0_i32_216 : i32
      %258 = arith.index_cast %257 : i32 to index
      %259 = memref.load %arg1[%258] : memref<98xf32, #tpu.memory_space<smem>>
      %c0_217 = arith.constant 0 : index
      %c0_218 = arith.constant 0 : index
      %260 = arith.index_cast %arg8 : i32 to index
      %c0_219 = arith.constant 0 : index
      %261 = vector.load %arg6[%c0_217, %c0_218, %260, %c0_219] : memref<2x7x22x16xf32, #tpu.memory_space<vmem>>, vector<1x1x16x16xf32>
      %262 = vector.shape_cast %261 : vector<1x1x16x16xf32> to vector<16x16xf32>
      %c1_220 = arith.constant 1 : index
      %c0_221 = arith.constant 0 : index
      %263 = arith.index_cast %arg8 : i32 to index
      %c0_222 = arith.constant 0 : index
      %264 = vector.load %arg6[%c1_220, %c0_221, %263, %c0_222] : memref<2x7x22x16xf32, #tpu.memory_space<vmem>>, vector<1x1x16x16xf32>
      %265 = vector.shape_cast %264 : vector<1x1x16x16xf32> to vector<16x16xf32>
      %266 = vector.broadcast %254 : f32 to vector<16x16xf32>
      %267 = arith.mulf %266, %262 : vector<16x16xf32>
      %268 = arith.addf %arg9, %267 : vector<16x16xf32>
      %269 = vector.broadcast %259 : f32 to vector<16x16xf32>
      %270 = arith.mulf %269, %265 : vector<16x16xf32>
      %271 = arith.addf %268, %270 : vector<16x16xf32>
      %c7_i32_223 = arith.constant 7 : i32
      %272 = arith.muli %arg8, %c7_i32_223 : i32
      %c1_i32_224 = arith.constant 1 : i32
      %273 = arith.addi %272, %c1_i32_224 : i32
      %274 = arith.index_cast %273 : i32 to index
      %275 = memref.load %arg1[%274] : memref<98xf32, #tpu.memory_space<smem>>
      %c7_i32_225 = arith.constant 7 : i32
      %276 = arith.muli %arg8, %c7_i32_225 : i32
      %c49_i32_226 = arith.constant 49 : i32
      %277 = arith.addi %c49_i32_226, %276 : i32
      %c1_i32_227 = arith.constant 1 : i32
      %278 = arith.addi %277, %c1_i32_227 : i32
      %279 = arith.index_cast %278 : i32 to index
      %280 = memref.load %arg1[%279] : memref<98xf32, #tpu.memory_space<smem>>
      %c0_228 = arith.constant 0 : index
      %c1_229 = arith.constant 1 : index
      %281 = arith.index_cast %arg8 : i32 to index
      %c0_230 = arith.constant 0 : index
      %282 = vector.load %arg6[%c0_228, %c1_229, %281, %c0_230] : memref<2x7x22x16xf32, #tpu.memory_space<vmem>>, vector<1x1x16x16xf32>
      %283 = vector.shape_cast %282 : vector<1x1x16x16xf32> to vector<16x16xf32>
      %c1_231 = arith.constant 1 : index
      %c1_232 = arith.constant 1 : index
      %284 = arith.index_cast %arg8 : i32 to index
      %c0_233 = arith.constant 0 : index
      %285 = vector.load %arg6[%c1_231, %c1_232, %284, %c0_233] : memref<2x7x22x16xf32, #tpu.memory_space<vmem>>, vector<1x1x16x16xf32>
      %286 = vector.shape_cast %285 : vector<1x1x16x16xf32> to vector<16x16xf32>
      %287 = vector.broadcast %275 : f32 to vector<16x16xf32>
      %288 = arith.mulf %287, %283 : vector<16x16xf32>
      %289 = arith.addf %271, %288 : vector<16x16xf32>
      %290 = vector.broadcast %280 : f32 to vector<16x16xf32>
      %291 = arith.mulf %290, %286 : vector<16x16xf32>
      %292 = arith.addf %289, %291 : vector<16x16xf32>
      %c7_i32_234 = arith.constant 7 : i32
      %293 = arith.muli %arg8, %c7_i32_234 : i32
      %c2_i32 = arith.constant 2 : i32
      %294 = arith.addi %293, %c2_i32 : i32
      %295 = arith.index_cast %294 : i32 to index
      %296 = memref.load %arg1[%295] : memref<98xf32, #tpu.memory_space<smem>>
      %c7_i32_235 = arith.constant 7 : i32
      %297 = arith.muli %arg8, %c7_i32_235 : i32
      %c49_i32_236 = arith.constant 49 : i32
      %298 = arith.addi %c49_i32_236, %297 : i32
      %c2_i32_237 = arith.constant 2 : i32
      %299 = arith.addi %298, %c2_i32_237 : i32
      %300 = arith.index_cast %299 : i32 to index
      %301 = memref.load %arg1[%300] : memref<98xf32, #tpu.memory_space<smem>>
      %c0_238 = arith.constant 0 : index
      %c2_239 = arith.constant 2 : index
      %302 = arith.index_cast %arg8 : i32 to index
      %c0_240 = arith.constant 0 : index
      %303 = vector.load %arg6[%c0_238, %c2_239, %302, %c0_240] : memref<2x7x22x16xf32, #tpu.memory_space<vmem>>, vector<1x1x16x16xf32>
      %304 = vector.shape_cast %303 : vector<1x1x16x16xf32> to vector<16x16xf32>
      %c1_241 = arith.constant 1 : index
      %c2_242 = arith.constant 2 : index
      %305 = arith.index_cast %arg8 : i32 to index
      %c0_243 = arith.constant 0 : index
      %306 = vector.load %arg6[%c1_241, %c2_242, %305, %c0_243] : memref<2x7x22x16xf32, #tpu.memory_space<vmem>>, vector<1x1x16x16xf32>
      %307 = vector.shape_cast %306 : vector<1x1x16x16xf32> to vector<16x16xf32>
      %308 = vector.broadcast %296 : f32 to vector<16x16xf32>
      %309 = arith.mulf %308, %304 : vector<16x16xf32>
      %310 = arith.addf %292, %309 : vector<16x16xf32>
      %311 = vector.broadcast %301 : f32 to vector<16x16xf32>
      %312 = arith.mulf %311, %307 : vector<16x16xf32>
      %313 = arith.addf %310, %312 : vector<16x16xf32>
      %c7_i32_244 = arith.constant 7 : i32
      %314 = arith.muli %arg8, %c7_i32_244 : i32
      %c3_i32_245 = arith.constant 3 : i32
      %315 = arith.addi %314, %c3_i32_245 : i32
      %316 = arith.index_cast %315 : i32 to index
      %317 = memref.load %arg1[%316] : memref<98xf32, #tpu.memory_space<smem>>
      %c7_i32_246 = arith.constant 7 : i32
      %318 = arith.muli %arg8, %c7_i32_246 : i32
      %c49_i32_247 = arith.constant 49 : i32
      %319 = arith.addi %c49_i32_247, %318 : i32
      %c3_i32_248 = arith.constant 3 : i32
      %320 = arith.addi %319, %c3_i32_248 : i32
      %321 = arith.index_cast %320 : i32 to index
      %322 = memref.load %arg1[%321] : memref<98xf32, #tpu.memory_space<smem>>
      %c0_249 = arith.constant 0 : index
      %c3_250 = arith.constant 3 : index
      %323 = arith.index_cast %arg8 : i32 to index
      %c0_251 = arith.constant 0 : index
      %324 = vector.load %arg6[%c0_249, %c3_250, %323, %c0_251] : memref<2x7x22x16xf32, #tpu.memory_space<vmem>>, vector<1x1x16x16xf32>
      %325 = vector.shape_cast %324 : vector<1x1x16x16xf32> to vector<16x16xf32>
      %c1_252 = arith.constant 1 : index
      %c3_253 = arith.constant 3 : index
      %326 = arith.index_cast %arg8 : i32 to index
      %c0_254 = arith.constant 0 : index
      %327 = vector.load %arg6[%c1_252, %c3_253, %326, %c0_254] : memref<2x7x22x16xf32, #tpu.memory_space<vmem>>, vector<1x1x16x16xf32>
      %328 = vector.shape_cast %327 : vector<1x1x16x16xf32> to vector<16x16xf32>
      %329 = vector.broadcast %317 : f32 to vector<16x16xf32>
      %330 = arith.mulf %329, %325 : vector<16x16xf32>
      %331 = arith.addf %313, %330 : vector<16x16xf32>
      %332 = vector.broadcast %322 : f32 to vector<16x16xf32>
      %333 = arith.mulf %332, %328 : vector<16x16xf32>
      %334 = arith.addf %331, %333 : vector<16x16xf32>
      %c7_i32_255 = arith.constant 7 : i32
      %335 = arith.muli %arg8, %c7_i32_255 : i32
      %c4_i32_256 = arith.constant 4 : i32
      %336 = arith.addi %335, %c4_i32_256 : i32
      %337 = arith.index_cast %336 : i32 to index
      %338 = memref.load %arg1[%337] : memref<98xf32, #tpu.memory_space<smem>>
      %c7_i32_257 = arith.constant 7 : i32
      %339 = arith.muli %arg8, %c7_i32_257 : i32
      %c49_i32_258 = arith.constant 49 : i32
      %340 = arith.addi %c49_i32_258, %339 : i32
      %c4_i32_259 = arith.constant 4 : i32
      %341 = arith.addi %340, %c4_i32_259 : i32
      %342 = arith.index_cast %341 : i32 to index
      %343 = memref.load %arg1[%342] : memref<98xf32, #tpu.memory_space<smem>>
      %c0_260 = arith.constant 0 : index
      %c4_261 = arith.constant 4 : index
      %344 = arith.index_cast %arg8 : i32 to index
      %c0_262 = arith.constant 0 : index
      %345 = vector.load %arg6[%c0_260, %c4_261, %344, %c0_262] : memref<2x7x22x16xf32, #tpu.memory_space<vmem>>, vector<1x1x16x16xf32>
      %346 = vector.shape_cast %345 : vector<1x1x16x16xf32> to vector<16x16xf32>
      %c1_263 = arith.constant 1 : index
      %c4_264 = arith.constant 4 : index
      %347 = arith.index_cast %arg8 : i32 to index
      %c0_265 = arith.constant 0 : index
      %348 = vector.load %arg6[%c1_263, %c4_264, %347, %c0_265] : memref<2x7x22x16xf32, #tpu.memory_space<vmem>>, vector<1x1x16x16xf32>
      %349 = vector.shape_cast %348 : vector<1x1x16x16xf32> to vector<16x16xf32>
      %350 = vector.broadcast %338 : f32 to vector<16x16xf32>
      %351 = arith.mulf %350, %346 : vector<16x16xf32>
      %352 = arith.addf %334, %351 : vector<16x16xf32>
      %353 = vector.broadcast %343 : f32 to vector<16x16xf32>
      %354 = arith.mulf %353, %349 : vector<16x16xf32>
      %355 = arith.addf %352, %354 : vector<16x16xf32>
      %c7_i32_266 = arith.constant 7 : i32
      %356 = arith.muli %arg8, %c7_i32_266 : i32
      %c5_i32 = arith.constant 5 : i32
      %357 = arith.addi %356, %c5_i32 : i32
      %358 = arith.index_cast %357 : i32 to index
      %359 = memref.load %arg1[%358] : memref<98xf32, #tpu.memory_space<smem>>
      %c7_i32_267 = arith.constant 7 : i32
      %360 = arith.muli %arg8, %c7_i32_267 : i32
      %c49_i32_268 = arith.constant 49 : i32
      %361 = arith.addi %c49_i32_268, %360 : i32
      %c5_i32_269 = arith.constant 5 : i32
      %362 = arith.addi %361, %c5_i32_269 : i32
      %363 = arith.index_cast %362 : i32 to index
      %364 = memref.load %arg1[%363] : memref<98xf32, #tpu.memory_space<smem>>
      %c0_270 = arith.constant 0 : index
      %c5_271 = arith.constant 5 : index
      %365 = arith.index_cast %arg8 : i32 to index
      %c0_272 = arith.constant 0 : index
      %366 = vector.load %arg6[%c0_270, %c5_271, %365, %c0_272] : memref<2x7x22x16xf32, #tpu.memory_space<vmem>>, vector<1x1x16x16xf32>
      %367 = vector.shape_cast %366 : vector<1x1x16x16xf32> to vector<16x16xf32>
      %c1_273 = arith.constant 1 : index
      %c5_274 = arith.constant 5 : index
      %368 = arith.index_cast %arg8 : i32 to index
      %c0_275 = arith.constant 0 : index
      %369 = vector.load %arg6[%c1_273, %c5_274, %368, %c0_275] : memref<2x7x22x16xf32, #tpu.memory_space<vmem>>, vector<1x1x16x16xf32>
      %370 = vector.shape_cast %369 : vector<1x1x16x16xf32> to vector<16x16xf32>
      %371 = vector.broadcast %359 : f32 to vector<16x16xf32>
      %372 = arith.mulf %371, %367 : vector<16x16xf32>
      %373 = arith.addf %355, %372 : vector<16x16xf32>
      %374 = vector.broadcast %364 : f32 to vector<16x16xf32>
      %375 = arith.mulf %374, %370 : vector<16x16xf32>
      %376 = arith.addf %373, %375 : vector<16x16xf32>
      %c7_i32_276 = arith.constant 7 : i32
      %377 = arith.muli %arg8, %c7_i32_276 : i32
      %c6_i32 = arith.constant 6 : i32
      %378 = arith.addi %377, %c6_i32 : i32
      %379 = arith.index_cast %378 : i32 to index
      %380 = memref.load %arg1[%379] : memref<98xf32, #tpu.memory_space<smem>>
      %c7_i32_277 = arith.constant 7 : i32
      %381 = arith.muli %arg8, %c7_i32_277 : i32
      %c49_i32_278 = arith.constant 49 : i32
      %382 = arith.addi %c49_i32_278, %381 : i32
      %c6_i32_279 = arith.constant 6 : i32
      %383 = arith.addi %382, %c6_i32_279 : i32
      %384 = arith.index_cast %383 : i32 to index
      %385 = memref.load %arg1[%384] : memref<98xf32, #tpu.memory_space<smem>>
      %c0_280 = arith.constant 0 : index
      %c6_281 = arith.constant 6 : index
      %386 = arith.index_cast %arg8 : i32 to index
      %c0_282 = arith.constant 0 : index
      %387 = vector.load %arg6[%c0_280, %c6_281, %386, %c0_282] : memref<2x7x22x16xf32, #tpu.memory_space<vmem>>, vector<1x1x16x16xf32>
      %388 = vector.shape_cast %387 : vector<1x1x16x16xf32> to vector<16x16xf32>
      %c1_283 = arith.constant 1 : index
      %c6_284 = arith.constant 6 : index
      %389 = arith.index_cast %arg8 : i32 to index
      %c0_285 = arith.constant 0 : index
      %390 = vector.load %arg6[%c1_283, %c6_284, %389, %c0_285] : memref<2x7x22x16xf32, #tpu.memory_space<vmem>>, vector<1x1x16x16xf32>
      %391 = vector.shape_cast %390 : vector<1x1x16x16xf32> to vector<16x16xf32>
      %392 = vector.broadcast %380 : f32 to vector<16x16xf32>
      %393 = arith.mulf %392, %388 : vector<16x16xf32>
      %394 = arith.addf %376, %393 : vector<16x16xf32>
      %395 = vector.broadcast %385 : f32 to vector<16x16xf32>
      %396 = arith.mulf %395, %391 : vector<16x16xf32>
      %397 = arith.addf %394, %396 : vector<16x16xf32>
      scf.yield %397 : vector<16x16xf32>
    }
    %c7_i32_186 = arith.constant 7 : i32
    %cst_187 = arith.constant 5.000000e-01 : f32
    %210 = vector.broadcast %cst_187 : f32 to vector<16x16xf32>
    %211 = arith.mulf %210, %209 : vector<16x16xf32>
    %212 = math.tanh %211 : vector<16x16xf32>
    %cst_188 = arith.constant 1.000000e+00 : f32
    %213 = vector.broadcast %cst_188 : f32 to vector<16x16xf32>
    %214 = arith.addf %212, %213 : vector<16x16xf32>
    %cst_189 = arith.constant 5.000000e-01 : f32
    %215 = vector.broadcast %cst_189 : f32 to vector<16x16xf32>
    %216 = arith.mulf %215, %214 : vector<16x16xf32>
    %217 = vector.extract_strided_slice %216 {offsets = [0, 0], sizes = [1, 16], strides = [1, 1]} : vector<16x16xf32> to vector<1x16xf32>
    %c0_190 = arith.constant 0 : index
    %c0_191 = arith.constant 0 : index
    %218 = vector.load %arg7[%c0_190, %c0_191] : memref<1x256xf32, #tpu.memory_space<vmem>>, vector<1x16xf32>
    tpu.vector_store %arg7[%c0_190, %c0_191], %217 {strides = array<i32>} : memref<1x256xf32, #tpu.memory_space<vmem>>, vector<1x16xf32>,
    %219 = vector.extract_strided_slice %216 {offsets = [1, 0], sizes = [1, 16], strides = [1, 1]} : vector<16x16xf32> to vector<1x16xf32>
    %c0_192 = arith.constant 0 : index
    %c16_193 = arith.constant 16 : index
    %220 = vector.load %arg7[%c0_192, %c16_193] : memref<1x256xf32, #tpu.memory_space<vmem>>, vector<1x16xf32>
    tpu.vector_store %arg7[%c0_192, %c16_193], %219 {strides = array<i32>} : memref<1x256xf32, #tpu.memory_space<vmem>>, vector<1x16xf32>,
    %221 = vector.extract_strided_slice %216 {offsets = [2, 0], sizes = [1, 16], strides = [1, 1]} : vector<16x16xf32> to vector<1x16xf32>
    %c0_194 = arith.constant 0 : index
    %c32 = arith.constant 32 : index
    %222 = vector.load %arg7[%c0_194, %c32] : memref<1x256xf32, #tpu.memory_space<vmem>>, vector<1x16xf32>
    tpu.vector_store %arg7[%c0_194, %c32], %221 {strides = array<i32>} : memref<1x256xf32, #tpu.memory_space<vmem>>, vector<1x16xf32>,
    %223 = vector.extract_strided_slice %216 {offsets = [3, 0], sizes = [1, 16], strides = [1, 1]} : vector<16x16xf32> to vector<1x16xf32>
    %c0_195 = arith.constant 0 : index
    %c48 = arith.constant 48 : index
    %224 = vector.load %arg7[%c0_195, %c48] : memref<1x256xf32, #tpu.memory_space<vmem>>, vector<1x16xf32>
    tpu.vector_store %arg7[%c0_195, %c48], %223 {strides = array<i32>} : memref<1x256xf32, #tpu.memory_space<vmem>>, vector<1x16xf32>,
    %225 = vector.extract_strided_slice %216 {offsets = [4, 0], sizes = [1, 16], strides = [1, 1]} : vector<16x16xf32> to vector<1x16xf32>
    %c0_196 = arith.constant 0 : index
    %c64 = arith.constant 64 : index
    %226 = vector.load %arg7[%c0_196, %c64] : memref<1x256xf32, #tpu.memory_space<vmem>>, vector<1x16xf32>
    tpu.vector_store %arg7[%c0_196, %c64], %225 {strides = array<i32>} : memref<1x256xf32, #tpu.memory_space<vmem>>, vector<1x16xf32>,
    %227 = vector.extract_strided_slice %216 {offsets = [5, 0], sizes = [1, 16], strides = [1, 1]} : vector<16x16xf32> to vector<1x16xf32>
    %c0_197 = arith.constant 0 : index
    %c80 = arith.constant 80 : index
    %228 = vector.load %arg7[%c0_197, %c80] : memref<1x256xf32, #tpu.memory_space<vmem>>, vector<1x16xf32>
    tpu.vector_store %arg7[%c0_197, %c80], %227 {strides = array<i32>} : memref<1x256xf32, #tpu.memory_space<vmem>>, vector<1x16xf32>,
    %229 = vector.extract_strided_slice %216 {offsets = [6, 0], sizes = [1, 16], strides = [1, 1]} : vector<16x16xf32> to vector<1x16xf32>
    %c0_198 = arith.constant 0 : index
    %c96 = arith.constant 96 : index
    %230 = vector.load %arg7[%c0_198, %c96] : memref<1x256xf32, #tpu.memory_space<vmem>>, vector<1x16xf32>
    tpu.vector_store %arg7[%c0_198, %c96], %229 {strides = array<i32>} : memref<1x256xf32, #tpu.memory_space<vmem>>, vector<1x16xf32>,
    %231 = vector.extract_strided_slice %216 {offsets = [7, 0], sizes = [1, 16], strides = [1, 1]} : vector<16x16xf32> to vector<1x16xf32>
    %c0_199 = arith.constant 0 : index
    %c112 = arith.constant 112 : index
    %232 = vector.load %arg7[%c0_199, %c112] : memref<1x256xf32, #tpu.memory_space<vmem>>, vector<1x16xf32>
    tpu.vector_store %arg7[%c0_199, %c112], %231 {strides = array<i32>} : memref<1x256xf32, #tpu.memory_space<vmem>>, vector<1x16xf32>,
    %233 = vector.extract_strided_slice %216 {offsets = [8, 0], sizes = [1, 16], strides = [1, 1]} : vector<16x16xf32> to vector<1x16xf32>
    %c0_200 = arith.constant 0 : index
    %c128 = arith.constant 128 : index
    %234 = vector.load %arg7[%c0_200, %c128] : memref<1x256xf32, #tpu.memory_space<vmem>>, vector<1x16xf32>
    tpu.vector_store %arg7[%c0_200, %c128], %233 {strides = array<i32>} : memref<1x256xf32, #tpu.memory_space<vmem>>, vector<1x16xf32>,
    %235 = vector.extract_strided_slice %216 {offsets = [9, 0], sizes = [1, 16], strides = [1, 1]} : vector<16x16xf32> to vector<1x16xf32>
    %c0_201 = arith.constant 0 : index
    %c144 = arith.constant 144 : index
    %236 = vector.load %arg7[%c0_201, %c144] : memref<1x256xf32, #tpu.memory_space<vmem>>, vector<1x16xf32>
    tpu.vector_store %arg7[%c0_201, %c144], %235 {strides = array<i32>} : memref<1x256xf32, #tpu.memory_space<vmem>>, vector<1x16xf32>,
    %237 = vector.extract_strided_slice %216 {offsets = [10, 0], sizes = [1, 16], strides = [1, 1]} : vector<16x16xf32> to vector<1x16xf32>
    %c0_202 = arith.constant 0 : index
    %c160 = arith.constant 160 : index
    %238 = vector.load %arg7[%c0_202, %c160] : memref<1x256xf32, #tpu.memory_space<vmem>>, vector<1x16xf32>
    tpu.vector_store %arg7[%c0_202, %c160], %237 {strides = array<i32>} : memref<1x256xf32, #tpu.memory_space<vmem>>, vector<1x16xf32>,
    %239 = vector.extract_strided_slice %216 {offsets = [11, 0], sizes = [1, 16], strides = [1, 1]} : vector<16x16xf32> to vector<1x16xf32>
    %c0_203 = arith.constant 0 : index
    %c176 = arith.constant 176 : index
    %240 = vector.load %arg7[%c0_203, %c176] : memref<1x256xf32, #tpu.memory_space<vmem>>, vector<1x16xf32>
    tpu.vector_store %arg7[%c0_203, %c176], %239 {strides = array<i32>} : memref<1x256xf32, #tpu.memory_space<vmem>>, vector<1x16xf32>,
    %241 = vector.extract_strided_slice %216 {offsets = [12, 0], sizes = [1, 16], strides = [1, 1]} : vector<16x16xf32> to vector<1x16xf32>
    %c0_204 = arith.constant 0 : index
    %c192 = arith.constant 192 : index
    %242 = vector.load %arg7[%c0_204, %c192] : memref<1x256xf32, #tpu.memory_space<vmem>>, vector<1x16xf32>
    tpu.vector_store %arg7[%c0_204, %c192], %241 {strides = array<i32>} : memref<1x256xf32, #tpu.memory_space<vmem>>, vector<1x16xf32>,
    %243 = vector.extract_strided_slice %216 {offsets = [13, 0], sizes = [1, 16], strides = [1, 1]} : vector<16x16xf32> to vector<1x16xf32>
    %c0_205 = arith.constant 0 : index
    %c208 = arith.constant 208 : index
    %244 = vector.load %arg7[%c0_205, %c208] : memref<1x256xf32, #tpu.memory_space<vmem>>, vector<1x16xf32>
    tpu.vector_store %arg7[%c0_205, %c208], %243 {strides = array<i32>} : memref<1x256xf32, #tpu.memory_space<vmem>>, vector<1x16xf32>,
    %245 = vector.extract_strided_slice %216 {offsets = [14, 0], sizes = [1, 16], strides = [1, 1]} : vector<16x16xf32> to vector<1x16xf32>
    %c0_206 = arith.constant 0 : index
    %c224 = arith.constant 224 : index
    %246 = vector.load %arg7[%c0_206, %c224] : memref<1x256xf32, #tpu.memory_space<vmem>>, vector<1x16xf32>
    tpu.vector_store %arg7[%c0_206, %c224], %245 {strides = array<i32>} : memref<1x256xf32, #tpu.memory_space<vmem>>, vector<1x16xf32>,
    %247 = vector.extract_strided_slice %216 {offsets = [15, 0], sizes = [1, 16], strides = [1, 1]} : vector<16x16xf32> to vector<1x16xf32>
    %c0_207 = arith.constant 0 : index
    %c240 = arith.constant 240 : index
    %248 = vector.load %arg7[%c0_207, %c240] : memref<1x256xf32, #tpu.memory_space<vmem>>, vector<1x16xf32>
    tpu.vector_store %arg7[%c0_207, %c240], %247 {strides = array<i32>} : memref<1x256xf32, #tpu.memory_space<vmem>>, vector<1x16xf32>,
    %c0_208 = arith.constant 0 : index
    %c0_209 = arith.constant 0 : index
    %249 = vector.load %arg7[%c0_208, %c0_209] : memref<1x256xf32, #tpu.memory_space<vmem>>, vector<1x256xf32>
    %c0_i32_210 = arith.constant 0 : i32
    %c4_i32 = arith.constant 4 : i32
    %250 = arith.addi %c0_i32_210, %c4_i32 : i32
    %c1_i32_211 = arith.constant 1 : i32
    scf.for %arg8 = %c0_i32_210 to %250 step %c1_i32_211  : i32 {
      %c0_213 = arith.constant 0 : index
      %251 = arith.index_cast %arg8 : i32 to index
      %c0_214 = arith.constant 0 : index
      %252 = vector.load %arg3[%c0_213, %251, %c0_214] : memref<1x4x256xf32, #tpu.memory_space<vmem>>, vector<1x1x256xf32>
      %253 = vector.shape_cast %252 : vector<1x1x256xf32> to vector<1x256xf32>
      %254 = arith.mulf %253, %249 : vector<1x256xf32>
      %c0_215 = arith.constant 0 : index
      %255 = arith.index_cast %arg8 : i32 to index
      %c0_216 = arith.constant 0 : index
      %256 = vector.load %arg4[%c0_215, %255, %c0_216] : memref<1x4x256xf32, #tpu.memory_space<vmem>>, vector<1x1x256xf32>
      %257 = vector.shape_cast %256 : vector<1x1x256xf32> to vector<1x256xf32>
      %258 = vector.shape_cast %254 : vector<1x256xf32> to vector<1x1x256xf32>
      tpu.vector_store %arg4[%c0_215, %255, %c0_216], %258 {strides = array<i32>} : memref<1x4x256xf32, #tpu.memory_space<vmem>>, vector<1x1x256xf32>,
    }
    %c4_i32_212 = arith.constant 4 : i32
    return
  }
  func.func @transform_0(%arg0: i32) -> i32 {
    %c0_i32 = arith.constant 0 : i32
    %c0_i32_0 = arith.constant 0 : i32
    return %c0_i32 : i32
  }
  func.func @transform_1(%arg0: i32) -> i32 {
    %c0_i32 = arith.constant 0 : i32
    %c0_i32_0 = arith.constant 0 : i32
    return %c0_i32 : i32
  }
  func.func @transform_2(%arg0: i32) -> (i32, i32, i32) {
    %c0_i32 = arith.constant 0 : i32
    %c0_i32_0 = arith.constant 0 : i32
    %c0_i32_1 = arith.constant 0 : i32
    return %arg0, %c0_i32, %c0_i32_0 : i32, i32, i32
  }
  func.func @transform_3(%arg0: i32) -> (i32, i32, i32) {
    %c0_i32 = arith.constant 0 : i32
    %c0_i32_0 = arith.constant 0 : i32
    %c0_i32_1 = arith.constant 0 : i32
    return %arg0, %c0_i32, %c0_i32_0 : i32, i32, i32
  }
}

</mosaic_0001>

<bundles_post_ra>
// kernel: spatial_attention_forward.1
= control target key start
LH: loop header
LB: loop body
LE: loop exit
PB: predicated region body
PF: predicated region fallthrough
CT: control target
= control target key end

     0   :  { %s1847_s0 = inlined_call_operand.vmem [shape: f32[98], index: 0, kind: input, shape index: {}]   ;;  %s1848_s1 = inlined_call_operand.<no memory space> [shape: f32[1], index: 1, kind: input, shape index: {}]   ;;  %s1849_s2 = inlined_call_operand.vmem [shape: f32[2,4,256], index: 2, kind: input, shape index: {}]   ;;  %s1850_s3 = inlined_call_operand.vmem [shape: f32[2,4,256], index: 3, kind: output, shape index: {}]  }
   0x1   :  { %8 = sst [smem:[#allocation5]] %s1848_s1 }
   0x2   :  { %9 = vsyncpa [#allocation7], 0  ;;  %s1378_s14 = smov 0  }
   0x3 LB: > { %s1101_s15 = sadd.s32 4294967295, %s1302_s14   ;;  %p1103_p0 = scmp.ge.s32.totalorder %s1302_s14, 1  ;;  %s1302_s14 = sphi %s1378_s14, %s15_s14  }
   0x4   : > { %p114_p1 = scmp.lt.s32.totalorder %s1302_s14, 3  ;;  %s126_s18 = sshll.u32 %s1847_s0, 4  ;;  %s127_s18 = int_to_ptr.vmem [resolvable:$true] %s126_s18 }
   0x5   : > { %p1156_p3 = scmp.eq.s32.totalorder %s1101_s15, 0  ;;  %s1332_s1 = smov [#allocation6]  }
   0x6   : > { %p115_p2 = pnand %p1103_p0, %p114_p1 }
   0x8   : > { %p1152_p4 = pneg %p115_p2  ;;  %150 = sbr.rel (%p115_p2) target bundleno = 857 (0x359), region = 32 }
   0xa   : > { %p1153_p5 = pnand %p1156_p3, %p1152_p4 }
   0xc   : > { %1155 = dma.vmem_to_smem (!%p1153_p5), %s127_s18, 16, %s1332_s1, [#allocation7]  }
   0xd   : > { %1297 = dma.done.wait (%p1156_p3), [#allocation7], 16  }
   0xe   : > { %1299 = vsyncadd (%p1156_p3), [#allocation7], 4294967280 }
   0xf   : > { %157 = sfence }
  0x10   : > { %p176_p6 = scmp.lt.s32.totalorder %s1101_s15, 1  ;;  %s1312_s26 = smov 1  }
  0x12   : > { %s1884_s15 = smov (!%p176_p6, %s1101_s15), 1 }
  0x13   : > { %s1144_s19 = sshll.u32 %s1884_s15, 3 }
  0x14   : > { %s1392_s22 = scalar_lea.vmem %s1849_s2, %s1144_s19  ;;  %s1397_s25 = scalar_lea.vmem %s1850_s3, %s1144_s19 }
  0x15   : > { %v186_v0 = vld [vmem:[%s1392_s22] ss:$4 sm:$0x3]  }
  0x16   : > { %v1304_v1 = vmov %v186_v0   ;;  %v1308_v2 = vmov %v186_v0  }
  0x17 LB: >> { %s195_s27 = sshra.s32 %s1314_s26, 2  ;;  %s198_s28 = sand.u32 3, %s1314_s26  ;;  %s1314_s26 = sphi %s1312_s26, %s192_s26   ;;  %v1310_v2 = vphi %v1308_v2, %v1309_v2   ;;  %v1306_v1 = vphi %v1304_v1, %v1305_v1  }
  0x18   : >> { %s1146_s29 = sshll.u32 %s195_s27, 3  ;;  %s192_s26 = sadd.s32 1, %s1314_s26  }
  0x19   : >> { %s201_s30 = sadd.s32 %s1146_s29, %s198_s28  ;;  %p189_p7 = scmp.ge.s32.totalorder %s192_s26, 4  }
  0x1a   : >> { %s202_s4 = scalar_lea.vmem %s1392_s22, %s201_s30  ;;  %s1333_s5 = smov (%p189_p7), 99   ;;  %vm207_vm0 = vcmask (%p189_p7), 179200   ;;  %v1343_v13 = vmov (%p189_p7), 0.0   ;;  %vm220_vm1 = vcmask (%p189_p7), 147480   ;;  %vm412_vm2 = vcmask (%p189_p7), 130048  }
  0x1b   : >> { %v203_v3 = vld [vmem:[%s202_s4] ss:$4 sm:$0x3]  ;;  %191 = sbr.rel (!%p189_p7) target bundleno = 23 (0x17), region = 133  ;;  %s1334_s6 = smov (%p189_p7), 3   ;;  %208 = vst.msk [vmem:[#allocation2] sm:$0xff] (%p189_p7), %vm207_vm0, %v1343_v13 }
  0x1c   : >> { %v204_v4 = vadd.f32 %v1310_v2, %v203_v3   ;;  %v1401_v1 = vmax.f32 %v1306_v1, %v203_v3   ;;  %s1335_s7 = smov (%p189_p7), 115   ;;  %s1336_s8 = smov (%p189_p7), 67   ;;  %209 = vst.msk [vmem:[#allocation2 + $0x8] sm:$0xff] (%p189_p7), %vm207_vm0, %v1343_v13  ;;  %vm210_vm3 = vcmask (%p189_p7), 177152   ;;  %vm415_vm4 = vcmask (%p189_p7), 128000  }
  0x1d   : > { %s1337_s9 = smov (%p189_p7), 83   ;;  %s1338_s10 = smov (%p189_p7), 51   ;;  %212 = vst.msk [vmem:[#allocation2 + $0x18] sm:$0xff] (%p189_p7), %vm207_vm0, %v1343_v13 }
  0x1e   : >> { %v1853_v5 = vmov %v1401_v1  ;;  %v1309_v2 = vmov %v204_v4   ;;  %v206_v6 = vmul.f32 (%p189_p7), 0.25, %v204_v4  ;;  %s1339_s11 = smov (%p189_p7), 19   ;;  %s1340_s12 = smov (%p189_p7), 35   ;;  %213 = vst.msk [vmem:[#allocation2 + $0x20] sm:$0xff] (%p189_p7), %vm207_vm0, %v1343_v13 }
  0x1f   : >> { %v1305_v1 = vmov %v1853_v5   ;;  %v223_v8 = vperm.slane (%p189_p7), %v1853_v5, 0  ;;  %v291_v9 = vrot.slane (%p189_p7), %v1853_v5, 1  ;;  %s1341_s13 = smov (%p189_p7), 112   ;;  %s1342_s15 = smov (%p189_p7), 96   ;;  %214 = vst.msk [vmem:[#allocation2 + $0x28] sm:$0x3f] (%p189_p7), %vm210_vm3, %v1343_v13 }
  0x20   : > { %v216_v7 = vperm.slane %v206_v6, 0  ;;  %v285_v10 = vrot.slane %v206_v6, 1  ;;  %s1344_s16 = smov 80   ;;  %s1345_s17 = smov 64   ;;  %211 = vst.msk [vmem:[#allocation2 + $0x10] sm:$0x3f] %vm210_vm3, %v1343_v13 }
  0x21   : > { %v292_v11 = vperm.slane %v291_v9, 0  ;;  %s1346_s18 = smov 48   ;;  %s1347_s1 = smov 32  }
  0x22   : > { %237 = vrot.lane.b32.xlu2 %v216_v7, %s1333_s5  ;;  %217 = vrot.lane.b32.xlu0 %v216_v7, %s1334_s6  ;;  %v286_v12 = vperm.slane %v285_v10, 0  ;;  %s1348_s19 = smov 16   ;;  %s1349_s20 = smov 127  }
  0x23   : > { %229 = vrot.lane.b32.xlu1 %v216_v7, %s1335_s7  ;;  %s1350_s21 = smov 126   ;;  %s1351_s23 = smov 125  }
  0x24   : > { %s1352_s24 = smov 124   ;;  %s1353_s26 = smov 123  }
  0x25   : > { %s1354_s27 = smov 122   ;;  %s652_s28 = sld [smem:[#allocation5]] }
  0x26   : > { %s1592_s29 = smov 0  }
  0x2a   : > { %241 = vrot.lane.b32.xlu2 %v223_v8, %s1333_s5  ;;  %224 = vrot.lane.b32.xlu0 %v223_v8, %s1334_s6 }
  0x2b   : > { %233 = vrot.lane.b32.xlu1 %v223_v8, %s1335_s7 }
  0x32   : > { %253 = vrot.lane.b32.xlu2 %v216_v7, %s1336_s8  ;;  %245 = vrot.lane.b32.xlu0 %v216_v7, %s1337_s9 }
  0x33   : > { %249 = vrot.lane.b32.xlu1 %v223_v8, %s1337_s9 }
  0x3a   : > { %265 = vrot.lane.b32.xlu2 %v223_v8, %s1338_s10  ;;  %257 = vrot.lane.b32.xlu0 %v223_v8, %s1336_s8 }
  0x3b   : > { %261 = vrot.lane.b32.xlu1 %v216_v7, %s1338_s10 }
  0x42   : > { %277 = vrot.lane.b32.xlu2 %v216_v7, %s1339_s11  ;;  %269 = vrot.lane.b32.xlu0 %v216_v7, %s1340_s12 }
  0x43   : > { %273 = vrot.lane.b32.xlu1 %v223_v8, %s1340_s12 }
  0x4a   : > { %293 = vrot.lane.b32.xlu2 %v292_v11, %s1334_s6  ;;  %281 = vrot.lane.b32.xlu0 %v223_v8, %s1339_s11 }
  0x4b   : > { %287 = vrot.lane.b32.xlu1 %v286_v12, %s1334_s6 }
  0x52   : > { %305 = vrot.lane.b32.xlu2 %v1853_v5, %s1341_s13  ;;  %297 = vrot.lane.b32.xlu0 %v206_v6, %s1341_s13 }
  0x53   : > { %313 = vrot.lane.b32.xlu1 %v206_v6, %s1342_s15 }
  0x5a   : > { %329 = vrot.lane.b32.xlu2 %v206_v6, %s1344_s16  ;;  %321 = vrot.lane.b32.xlu0 %v1853_v5, %s1342_s15 }
  0x5b   : > { %337 = vrot.lane.b32.xlu1 %v1853_v5, %s1344_s16 }
  0x62   : > { %353 = vrot.lane.b32.xlu2 %v1853_v5, %s1345_s17  ;;  %345 = vrot.lane.b32.xlu0 %v206_v6, %s1345_s17 }
  0x63   : > { %361 = vrot.lane.b32.xlu1 %v206_v6, %s1346_s18 }
  0x6a   : > { %377 = vrot.lane.b32.xlu2 %v206_v6, %s1347_s1  ;;  %369 = vrot.lane.b32.xlu0 %v1853_v5, %s1346_s18 }
  0x6b   : > { %393 = vrot.lane.b32.xlu1 %v206_v6, %s1348_s19 }
  0x72   : > { %401 = vrot.lane.b32.xlu2 %v1853_v5, %s1348_s19  ;;  %385 = vrot.lane.b32.xlu0 %v1853_v5, %s1347_s1 }
  0x7c   : > { %v238_v14 = vpop.permute.xlu2 %237 }
  0x7d   : > { %240 = vst.msk [vmem:[#allocation2 + $0x5] sm:$0x1] %vm220_vm1, %v238_v14 }
  0x84   : > { %v242_v15 = vpop.permute.xlu2 %241 }
  0x85   : > { %244 = vst.msk [vmem:[#allocation2 + $0x1d] sm:$0x1] %vm220_vm1, %v242_v15 }
  0x8c   : > { %v254_v16 = vpop.permute.xlu2 %253 }
  0x8d   : > { %256 = vst.msk [vmem:[#allocation2 + $0x7] sm:$0x1] %vm220_vm1, %v254_v16 }
  0x94   : > { %v266_v17 = vpop.permute.xlu2 %265  ;;  %v218_v18 = vpop.permute.xlu0 %217 }
  0x95   : > { %268 = vst.msk [vmem:[#allocation2 + $0x20] sm:$0x1] %vm220_vm1, %v266_v17  ;;  %v230_v19 = vpop.permute.xlu1 %229 }
  0x96   : > { %221 = vst.msk [vmem:[#allocation2 + $0x3] sm:$0x1] %vm220_vm1, %v218_v18 }
  0x97   : > { %232 = vst.msk [vmem:[#allocation2 + $0x4] sm:$0x1] %vm220_vm1, %v230_v19 }
  0x9c   : > { %v278_v20 = vpop.permute.xlu2 %277  ;;  %v225_v21 = vpop.permute.xlu0 %224 }
  0x9d   : > { %280 = vst.msk [vmem:[#allocation2 + $0xa] sm:$0x1] %vm220_vm1, %v278_v20  ;;  %v234_v22 = vpop.permute.xlu1 %233 }
  0x9e   : > { %228 = vst.msk [vmem:[#allocation2 + $0x1b] sm:$0x1] %vm220_vm1, %v225_v21 }
  0x9f   : > { %236 = vst.msk [vmem:[#allocation2 + $0x1c] sm:$0x1] %vm220_vm1, %v234_v22 }
  0xa4   : > { %v294_v23 = vpop.permute.xlu2 %293  ;;  %v246_v24 = vpop.permute.xlu0 %245 }
  0xa5   : > { %296 = vst.msk [vmem:[#allocation2 + $0x23] sm:$0x1] %vm220_vm1, %v294_v23  ;;  %v250_v25 = vpop.permute.xlu1 %249 }
  0xa6   : > { %248 = vst.msk [vmem:[#allocation2 + $0x6] sm:$0x1] %vm220_vm1, %v246_v24 }
  0xa7   : > { %252 = vst.msk [vmem:[#allocation2 + $0x1e] sm:$0x1] %vm220_vm1, %v250_v25 }
  0xac   : > { %v306_v26 = vpop.permute.xlu2 %305  ;;  %v258_v27 = vpop.permute.xlu0 %257 }
  0xad   : > { %v1447_v28 = vld [vmem:[#allocation2] sm:$0xff]  ;;  %v307_v29 = vrot.slane %v306_v26, 1  ;;  %260 = vst.msk [vmem:[#allocation2 + $0x1f] sm:$0x1] %vm220_vm1, %v258_v27  ;;  %v262_v30 = vpop.permute.xlu1 %261 }
  0xae   : > { %413 = vst.msk [vmem:[#allocation3] sm:$0xff] %vm412_vm2, %v1447_v28 }
  0xaf   : > { %v308_v31 = vperm.slane %v307_v29, 0  ;;  %264 = vst.msk [vmem:[#allocation2 + $0x8] sm:$0x1] %vm220_vm1, %v262_v30 }
  0xb1   : > { %309 = vrot.lane.b32.xlu0 %v308_v31, %s1334_s6 }
  0xb4   : > { %v1454_v32 = vld [vmem:[#allocation2 + $0x18] sm:$0xff]  ;;  %v330_v33 = vpop.permute.xlu2 %329  ;;  %v270_v34 = vpop.permute.xlu0 %269 }
  0xb5   : > { %421 = vst.msk [vmem:[#allocation3 + $0xa8] sm:$0xff] %vm412_vm2, %v1454_v32  ;;  %v274_v35 = vpop.permute.xlu1 %273  ;;  %v331_v54 = vrot.slane %v330_v33, 1 }
  0xb6   : > { %272 = vst.msk [vmem:[#allocation2 + $0x9] sm:$0x1] %vm220_vm1, %v270_v34 }
  0xb7   : > { %276 = vst.msk [vmem:[#allocation2 + $0x21] sm:$0x1] %vm220_vm1, %v274_v35  ;;  %v332_v58 = vperm.slane %v331_v54, 0 }
  0xbc   : > { %v354_v36 = vpop.permute.xlu2 %353  ;;  %v282_v37 = vpop.permute.xlu0 %281 }
  0xbd   : > { %v355_v38 = vrot.slane %v354_v36, 1  ;;  %284 = vst.msk [vmem:[#allocation2 + $0x22] sm:$0x1] %vm220_vm1, %v282_v37  ;;  %v288_v39 = vpop.permute.xlu1 %287 }
  0xbe   : > { %290 = vst.msk [vmem:[#allocation2 + $0xb] sm:$0x1] %vm220_vm1, %v288_v39 }
  0xbf   : > { %v356_v40 = vperm.slane %v355_v38, 0 }
  0xc1   : > { %357 = vrot.lane.b32.xlu0 %v356_v40, %s1334_s6 }
  0xc4   : > { %v378_v41 = vpop.permute.xlu2 %377  ;;  %v298_v42 = vpop.permute.xlu0 %297 }
  0xc5   : > { %v314_v43 = vpop.permute.xlu1 %313  ;;  %v379_v59 = vrot.slane %v378_v41, 1  ;;  %v299_v8 = vrot.slane %v298_v42, 1 }
  0xc6   : > { %v315_v53 = vrot.slane %v314_v43, 1 }
  0xc7   : > { %v380_v62 = vperm.slane %v379_v59, 0  ;;  %v300_v9 = vperm.slane %v299_v8, 0 }
  0xc8   : > { %v316_v57 = vperm.slane %v315_v53, 0 }
  0xcc   : > { %v402_v44 = vpop.permute.xlu2 %401  ;;  %v322_v45 = vpop.permute.xlu0 %321 }
  0xcd   : > { %v403_v46 = vrot.slane %v402_v44, 1  ;;  %v323_v47 = vrot.slane %v322_v45, 1  ;;  %v338_v48 = vpop.permute.xlu1 %337 }
  0xce   : > { %v339_v49 = vrot.slane %v338_v48, 1 }
  0xcf   : > { %v404_v50 = vperm.slane %v403_v46, 0  ;;  %v324_v51 = vperm.slane %v323_v47, 0 }
  0xd0   : > { %v340_v52 = vperm.slane %v339_v49, 0 }
  0xd1   : > { %405 = vrot.lane.b32.xlu0 %v404_v50, %s1334_s6  ;;  %325 = vrot.lane.b32.xlu1 %v324_v51, %s1334_s6 }
  0xd2   : > { %341 = vrot.lane.b32.xlu2 %v340_v52, %s1334_s6 }
  0xd4   : > { %v346_v55 = vpop.permute.xlu0 %345 }
  0xd5   : > { %v362_v56 = vpop.permute.xlu1 %361  ;;  %v347_v10 = vrot.slane %v346_v55, 1 }
  0xd6   : > { %v363_v60 = vrot.slane %v362_v56, 1 }
  0xd7   : > { %v348_v11 = vperm.slane %v347_v10, 0  ;;  %v653_v10 = vstv %s652_s28  }
  0xd8   : > { %v364_v0 = vperm.slane %v363_v60, 0 }
  0xd9   : > { %333 = vrot.lane.b32.xlu0 %v332_v58, %s1334_s6 }
  0xda   : > { %317 = vrot.lane.b32.xlu2 %v316_v57, %s1334_s6 }
  0xdc   : > { %v370_v61 = vpop.permute.xlu0 %369 }
  0xdd   : > { %v371_v63 = vrot.slane %v370_v61, 1  ;;  %v394_v2 = vpop.permute.xlu1 %393 }
  0xde   : > { %v395_v3 = vrot.slane %v394_v2, 1 }
  0xdf   : > { %v372_v1 = vperm.slane %v371_v63, 0 }
  0xe0   : > { %v396_v6 = vperm.slane %v395_v3, 0 }
  0xe1   : > { %381 = vrot.lane.b32.xlu0 %v380_v62, %s1334_s6  ;;  %373 = vrot.lane.b32.xlu1 %v372_v1, %s1334_s6 }
  0xe2   : > { %365 = vrot.lane.b32.xlu2 %v364_v0, %s1334_s6 }
  0xe4   : > { %v386_v4 = vpop.permute.xlu0 %385 }
  0xe5   : > { %v387_v5 = vrot.slane %v386_v4, 1 }
  0xe7   : > { %v388_v7 = vperm.slane %v387_v5, 0 }
  0xe9   : > { %389 = vrot.lane.b32.xlu1 %v388_v7, %s1334_s6 }
  0xea   : > { %397 = vrot.lane.b32.xlu2 %v396_v6, %s1334_s6 }
  0xf1   : > { %301 = vrot.lane.b32.xlu1 %v300_v9, %s1334_s6 }
  0xf9   : > { %349 = vrot.lane.b32.xlu1 %v348_v11, %s1334_s6 }
 0x101   : > { %430 = vrot.lane.b32.xlu1 %v1447_v28, %s1349_s20 }
 0x109   : > { %449 = vrot.lane.b32.xlu1 %v1454_v32, %s1349_s20 }
 0x111   : > { %468 = vrot.lane.b32.xlu1 %v1447_v28, %s1350_s21 }
 0x119   : > { %487 = vrot.lane.b32.xlu1 %v1454_v32, %s1350_s21 }
 0x121   : > { %506 = vrot.lane.b32.xlu1 %v1447_v28, %s1351_s23 }
 0x123   : > { %v310_v12 = vpop.permute.xlu0 %309 }
 0x124   : > { %312 = vst.msk [vmem:[#allocation2 + $0x24] sm:$0x1] %vm220_vm1, %v310_v12 }
 0x129   : > { %525 = vrot.lane.b32.xlu1 %v1454_v32, %s1351_s23 }
 0x12c   : > { %v342_v14 = vpop.permute.xlu2 %341 }
 0x12d   : > { %344 = vst.msk [vmem:[#allocation2 + $0x26] sm:$0x1] %vm220_vm1, %v342_v14 }
 0x131   : > { %544 = vrot.lane.b32.xlu1 %v1447_v28, %s1352_s24 }
 0x133   : > { %v358_v15 = vpop.permute.xlu0 %357 }
 0x134   : > { %360 = vst.msk [vmem:[#allocation2 + $0x27] sm:$0x1] %vm220_vm1, %v358_v15  ;;  %v318_v16 = vpop.permute.xlu2 %317 }
 0x135   : > { %320 = vst.msk [vmem:[#allocation2 + $0xd] sm:$0x1] %vm220_vm1, %v318_v16  ;;  %v1854_v16 = vmov %v653_v10 }
 0x139   : > { %563 = vrot.lane.b32.xlu1 %v1454_v32, %s1352_s24 }
 0x13c   : > { %v366_v17 = vpop.permute.xlu2 %365 }
 0x13d   : > { %368 = vst.msk [vmem:[#allocation2 + $0x10] sm:$0x1] %vm220_vm1, %v366_v17 }
 0x141   : > { %582 = vrot.lane.b32.xlu1 %v1447_v28, %s1353_s26 }
 0x143   : > { %v326_v13 = vpop.permute.xlu1 %325  ;;  %v406_v18 = vpop.permute.xlu0 %405 }
 0x144   : > { %328 = vst.msk [vmem:[#allocation2 + $0x25] sm:$0x1] %vm220_vm1, %v326_v13  ;;  %v398_v19 = vpop.permute.xlu2 %397 }
 0x145   : > { %408 = vst.msk [vmem:[#allocation2 + $0x2a] sm:$0x1] %vm220_vm1, %v406_v18 }
 0x146   : > { %400 = vst.msk [vmem:[#allocation2 + $0x12] sm:$0x1] %vm220_vm1, %v398_v19 }
 0x149   : > { %601 = vrot.lane.b32.xlu1 %v1454_v32, %s1353_s26 }
 0x14b   : > { %v1505_v20 = vld [vmem:[#allocation2 + $0x20] sm:$0xff]  ;;  %v334_v21 = vpop.permute.xlu0 %333 }
 0x14c   : > { %422 = vst.msk [vmem:[#allocation3 + $0xb0] sm:$0xff] %vm412_vm2, %v1505_v20  ;;  %451 = vrot.lane.b32.xlu2 %v1505_v20, %s1349_s20 }
 0x14d   : > { %336 = vst.msk [vmem:[#allocation2 + $0xe] sm:$0x1] %vm220_vm1, %v334_v21 }
 0x151   : > { %620 = vrot.lane.b32.xlu1 %v1447_v28, %s1354_s27 }
 0x153   : > { %v374_v22 = vpop.permute.xlu1 %373  ;;  %v382_v23 = vpop.permute.xlu0 %381 }
 0x154   : > { %376 = vst.msk [vmem:[#allocation2 + $0x28] sm:$0x1] %vm220_vm1, %v374_v22  ;;  %489 = vrot.lane.b32.xlu2 %v1505_v20, %s1350_s21 }
 0x155   : > { %384 = vst.msk [vmem:[#allocation2 + $0x11] sm:$0x1] %vm220_vm1, %v382_v23 }
 0x159   : > { %639 = vrot.lane.b32.xlu1 %v1454_v32, %s1354_s27 }
 0x15b   : > { %v390_v24 = vpop.permute.xlu1 %389 }
 0x15c   : > { %v411_v25 = vld [vmem:[#allocation2 + $0x10] sm:$0x3f]  ;;  %392 = vst.msk [vmem:[#allocation2 + $0x29] sm:$0x1] %vm220_vm1, %v390_v24  ;;  %527 = vrot.lane.b32.xlu2 %v1505_v20, %s1351_s23 }
 0x15d   : > { %416 = vst.msk [vmem:[#allocation3 + $0x10] sm:$0x3f] %vm415_vm4, %v411_v25  ;;  %v426_v39 = vld [vmem:[#allocation2 + $0x10] sm:$0x3f] }
 0x15e   : > { %v464_v41 = vld [vmem:[#allocation2 + $0x10] sm:$0x3f] }
 0x15f   : > { %v502_v43 = vld [vmem:[#allocation2 + $0x10] sm:$0x3f] }
 0x160   : > { %v540_v45 = vld [vmem:[#allocation2 + $0x10] sm:$0x3f] }
 0x161   : > { %v578_v48 = vld [vmem:[#allocation2 + $0x10] sm:$0x3f] }
 0x162   : > { %v616_v51 = vld [vmem:[#allocation2 + $0x10] sm:$0x3f] }
 0x163   : > { %v419_v26 = vld [vmem:[#allocation2 + $0x28] sm:$0x3f]  ;;  %v302_v27 = vpop.permute.xlu1 %301 }
 0x164   : > { %v445_v28 = vld [vmem:[#allocation2 + $0x28] sm:$0x3f]  ;;  %423 = vst.msk [vmem:[#allocation3 + $0xb8] sm:$0x3f] %vm415_vm4, %v419_v26  ;;  %565 = vrot.lane.b32.xlu2 %v1505_v20, %s1352_s24 }
 0x165   : > { %453 = vrot.lane.b32.xlu0 %v445_v28, %s1349_s20  ;;  %304 = vst.msk [vmem:[#allocation2 + $0xc] sm:$0x1] %vm220_vm1, %v302_v27  ;;  %v483_v30 = vld [vmem:[#allocation2 + $0x28] sm:$0x3f] }
 0x166   : > { %v521_v33 = vld [vmem:[#allocation2 + $0x28] sm:$0x3f] }
 0x167   : > { %v559_v35 = vld [vmem:[#allocation2 + $0x28] sm:$0x3f] }
 0x168   : > { %v597_v37 = vld [vmem:[#allocation2 + $0x28] sm:$0x3f] }
 0x169   : > { %v635_v54 = vld [vmem:[#allocation2 + $0x28] sm:$0x3f] }
 0x16b   : > { %v350_v29 = vpop.permute.xlu1 %349 }
 0x16c   : > { %352 = vst.msk [vmem:[#allocation2 + $0xf] sm:$0x1] %vm220_vm1, %v350_v29  ;;  %603 = vrot.lane.b32.xlu2 %v1505_v20, %s1353_s26 }
 0x16d   : > { %491 = vrot.lane.b32.xlu0 %v483_v30, %s1350_s21 }
 0x173   : > { %v410_v31 = vld [vmem:[#allocation2 + $0x8] sm:$0xff]  ;;  %v431_v32 = vpop.permute.xlu1 %430 }
 0x174   : > { %414 = vst.msk [vmem:[#allocation3 + $0x8] sm:$0xff] %vm412_vm2, %v410_v31  ;;  %432 = vrot.lane.b32.xlu2 %v410_v31, %s1349_s20 }
 0x175   : > { %529 = vrot.lane.b32.xlu0 %v521_v33, %s1351_s23  ;;  %440 = vst.msk [vmem:[#allocation3 + $0x18] sm:$0xff] %vm412_vm2, %v431_v32 }
 0x17b   : > { %v450_v34 = vpop.permute.xlu1 %449 }
 0x17c   : > { %459 = vst.msk [vmem:[#allocation3 + $0xc0] sm:$0xff] %vm412_vm2, %v450_v34  ;;  %470 = vrot.lane.b32.xlu2 %v410_v31, %s1350_s21 }
 0x17d   : > { %567 = vrot.lane.b32.xlu0 %v559_v35, %s1352_s24 }
 0x183   : > { %v469_v36 = vpop.permute.xlu1 %468 }
 0x184   : > { %478 = vst.msk [vmem:[#allocation3 + $0x30] sm:$0xff] %vm412_vm2, %v469_v36  ;;  %508 = vrot.lane.b32.xlu2 %v410_v31, %s1351_s23 }
 0x185   : > { %605 = vrot.lane.b32.xlu0 %v597_v37, %s1353_s26 }
 0x18b   : > { %v488_v38 = vpop.permute.xlu1 %487 }
 0x18c   : > { %497 = vst.msk [vmem:[#allocation3 + $0xd8] sm:$0xff] %vm412_vm2, %v488_v38  ;;  %546 = vrot.lane.b32.xlu2 %v410_v31, %s1352_s24 }
 0x18d   : > { %434 = vrot.lane.b32.xlu0 %v426_v39, %s1349_s20 }
 0x193   : > { %v507_v40 = vpop.permute.xlu1 %506 }
 0x194   : > { %516 = vst.msk [vmem:[#allocation3 + $0x48] sm:$0xff] %vm412_vm2, %v507_v40  ;;  %584 = vrot.lane.b32.xlu2 %v410_v31, %s1353_s26 }
 0x195   : > { %472 = vrot.lane.b32.xlu0 %v464_v41, %s1350_s21 }
 0x19b   : > { %v526_v42 = vpop.permute.xlu1 %525 }
 0x19c   : > { %535 = vst.msk [vmem:[#allocation3 + $0xf0] sm:$0xff] %vm412_vm2, %v526_v42  ;;  %622 = vrot.lane.b32.xlu2 %v410_v31, %s1354_s27 }
 0x19d   : > { %510 = vrot.lane.b32.xlu0 %v502_v43, %s1351_s23 }
 0x1a3   : > { %v545_v44 = vpop.permute.xlu1 %544 }
 0x1a4   : > { %554 = vst.msk [vmem:[#allocation3 + $0x60] sm:$0xff] %vm412_vm2, %v545_v44  ;;  %641 = vrot.lane.b32.xlu2 %v1505_v20, %s1354_s27 }
 0x1a5   : > { %548 = vrot.lane.b32.xlu0 %v540_v45, %s1352_s24 }
 0x1a6   : > { %v452_v46 = vpop.permute.xlu2 %451 }
 0x1a7   : > { %460 = vst.msk [vmem:[#allocation3 + $0xc8] sm:$0xff] %vm412_vm2, %v452_v46 }
 0x1ab   : > { %v564_v47 = vpop.permute.xlu1 %563 }
 0x1ac   : > { %573 = vst.msk [vmem:[#allocation3 + $0x108] sm:$0xff] %vm412_vm2, %v564_v47 }
 0x1ad   : > { %586 = vrot.lane.b32.xlu0 %v578_v48, %s1353_s26 }
 0x1ae   : > { %v490_v49 = vpop.permute.xlu2 %489 }
 0x1af   : > { %498 = vst.msk [vmem:[#allocation3 + $0xe0] sm:$0xff] %vm412_vm2, %v490_v49 }
 0x1b3   : > { %v583_v50 = vpop.permute.xlu1 %582 }
 0x1b4   : > { %592 = vst.msk [vmem:[#allocation3 + $0x78] sm:$0xff] %vm412_vm2, %v583_v50 }
 0x1b5   : > { %624 = vrot.lane.b32.xlu0 %v616_v51, %s1354_s27 }
 0x1b6   : > { %v528_v52 = vpop.permute.xlu2 %527 }
 0x1b7   : > { %536 = vst.msk [vmem:[#allocation3 + $0xf8] sm:$0xff] %vm412_vm2, %v528_v52 }
 0x1bb   : > { %v602_v53 = vpop.permute.xlu1 %601 }
 0x1bc   : > { %611 = vst.msk [vmem:[#allocation3 + $0x120] sm:$0xff] %vm412_vm2, %v602_v53 }
 0x1bd   : > { %643 = vrot.lane.b32.xlu0 %v635_v54, %s1354_s27 }
 0x1be   : > { %v566_v55 = vpop.permute.xlu2 %565 }
 0x1bf   : > { %574 = vst.msk [vmem:[#allocation3 + $0x110] sm:$0xff] %vm412_vm2, %v566_v55 }
 0x1c3   : > { %v621_v56 = vpop.permute.xlu1 %620 }
 0x1c4   : > { %630 = vst.msk [vmem:[#allocation3 + $0x90] sm:$0xff] %vm412_vm2, %v621_v56 }
 0x1c6   : > { %v604_v57 = vpop.permute.xlu2 %603 }
 0x1c7   : > { %612 = vst.msk [vmem:[#allocation3 + $0x128] sm:$0xff] %vm412_vm2, %v604_v57 }
 0x1cb   : > { %v640_v58 = vpop.permute.xlu1 %639 }
 0x1cc   : > { %649 = vst.msk [vmem:[#allocation3 + $0x138] sm:$0xff] %vm412_vm2, %v640_v58 }
 0x1ce   : > { %v433_v59 = vpop.permute.xlu2 %432 }
 0x1cf   : > { %441 = vst.msk [vmem:[#allocation3 + $0x20] sm:$0xff] %vm412_vm2, %v433_v59 }
 0x1d6   : > { %v471_v60 = vpop.permute.xlu2 %470 }
 0x1d7   : > { %v454_v61 = vpop.permute.xlu0 %453  ;;  %479 = vst.msk [vmem:[#allocation3 + $0x38] sm:$0xff] %vm412_vm2, %v471_v60 }
 0x1d8   : > { %461 = vst.msk [vmem:[#allocation3 + $0xd0] sm:$0x3f] %vm415_vm4, %v454_v61 }
 0x1de   : > { %v509_v62 = vpop.permute.xlu2 %508 }
 0x1df   : > { %v492_v63 = vpop.permute.xlu0 %491  ;;  %517 = vst.msk [vmem:[#allocation3 + $0x50] sm:$0xff] %vm412_vm2, %v509_v62 }
 0x1e0   : > { %499 = vst.msk [vmem:[#allocation3 + $0xe8] sm:$0x3f] %vm415_vm4, %v492_v63 }
 0x1e6   : > { %v547_v0 = vpop.permute.xlu2 %546 }
 0x1e7   : > { %v530_v1 = vpop.permute.xlu0 %529  ;;  %555 = vst.msk [vmem:[#allocation3 + $0x68] sm:$0xff] %vm412_vm2, %v547_v0 }
 0x1e8   : > { %537 = vst.msk [vmem:[#allocation3 + $0x100] sm:$0x3f] %vm415_vm4, %v530_v1 }
 0x1ee   : > { %v585_v2 = vpop.permute.xlu2 %584 }
 0x1ef   : > { %v568_v3 = vpop.permute.xlu0 %567  ;;  %593 = vst.msk [vmem:[#allocation3 + $0x80] sm:$0xff] %vm412_vm2, %v585_v2 }
 0x1f0   : > { %575 = vst.msk [vmem:[#allocation3 + $0x118] sm:$0x3f] %vm415_vm4, %v568_v3 }
 0x1f6   : > { %v623_v4 = vpop.permute.xlu2 %622 }
 0x1f7   : > { %v606_v5 = vpop.permute.xlu0 %605  ;;  %631 = vst.msk [vmem:[#allocation3 + $0x98] sm:$0xff] %vm412_vm2, %v623_v4 }
 0x1f8   : > { %613 = vst.msk [vmem:[#allocation3 + $0x130] sm:$0x3f] %vm415_vm4, %v606_v5 }
 0x1fe   : > { %v642_v6 = vpop.permute.xlu2 %641 }
 0x1ff   : > { %v435_v7 = vpop.permute.xlu0 %434  ;;  %650 = vst.msk [vmem:[#allocation3 + $0x140] sm:$0xff] %vm412_vm2, %v642_v6 }
 0x200   : > { %442 = vst.msk [vmem:[#allocation3 + $0x28] sm:$0x3f] %vm415_vm4, %v435_v7 }
 0x207   : > { %v473_v8 = vpop.permute.xlu0 %472 }
 0x208   : > { %480 = vst.msk [vmem:[#allocation3 + $0x40] sm:$0x3f] %vm415_vm4, %v473_v8 }
 0x20f   : > { %v511_v9 = vpop.permute.xlu0 %510 }
 0x210   : > { %518 = vst.msk [vmem:[#allocation3 + $0x58] sm:$0x3f] %vm415_vm4, %v511_v9 }
 0x217   : > { %v549_v11 = vpop.permute.xlu0 %548 }
 0x218   : > { %556 = vst.msk [vmem:[#allocation3 + $0x70] sm:$0x3f] %vm415_vm4, %v549_v11 }
 0x21f   : > { %v587_v12 = vpop.permute.xlu0 %586 }
 0x220   : > { %594 = vst.msk [vmem:[#allocation3 + $0x88] sm:$0x3f] %vm415_vm4, %v587_v12 }
 0x227   : > { %v625_v14 = vpop.permute.xlu0 %624 }
 0x228   : > { %632 = vst.msk [vmem:[#allocation3 + $0xa0] sm:$0x3f] %vm415_vm4, %v625_v14 }
 0x22f   : > { %v644_v15 = vpop.permute.xlu0 %643 }
 0x230   : > { %651 = vst.msk [vmem:[#allocation3 + $0x148] sm:$0x3f] %vm415_vm4, %v644_v15 }
 0x231 LB: >> { %s1600_s30 = smul.u32 7, %s1326_s29  ;;  %s1612_s12 = scalar_lea.vmem [#allocation3], %s1326_s29  ;;  %s1326_s29 = sphi %s1592_s29, %s659_s29   ;;  %v1322_v10 = vphi %v653_v10, %v1856_v10   ;;  %v1318_v16 = vphi %v1854_v16, %v1855_v16  }
 0x232   : >> { %s659_s29 = sadd.s32 1, %s1326_s29  }
 0x233   : >> { %s663_s4 = sld [smem:[#allocation6 + %s1600_s30]]  ;;  %s664_s5 = sadd.s32 49, %s1600_s30 }
 0x234   : >> { %s665_s6 = sld [smem:[#allocation6 + %s664_s5]]  ;;  %s683_s7 = sadd.s32 1, %s1600_s30 }
 0x235   : >> { %s1605_s8 = sld [smem:[#allocation6 + %s683_s7]]  ;;  %s685_s9 = sadd.s32 50, %s1600_s30 }
 0x236   : >> { %s1608_s10 = sld [smem:[#allocation6 + %s685_s9]]  ;;  %s705_s11 = sadd.s32 2, %s1600_s30 }
 0x237   : >> { %v667_v17 = vld [vmem:[%s1612_s12] sm:$0xff]  ;;  %v668_v13 = vld [vmem:[%s1612_s12 + $0x8] sm:$0xff]  ;;  %s1616_s20 = sld [smem:[#allocation6 + %s705_s11]]  ;;  %s707_s21 = sadd.s32 51, %s1600_s30  ;;  %v1115_v19 = vld [vmem:[%s1612_s12 + $0xb0] sm:$0xff] }
 0x238   : >> { %v1114_v18 = vld [vmem:[%s1612_s12 + $0xa8] sm:$0xff]  ;;  %s1621_s23 = sld [smem:[#allocation6 + %s707_s21]]  ;;  %s727_s24 = sadd.s32 3, %s1600_s30  ;;  %v1116_v21 = vld [vmem:[%s1612_s12 + $0x18] sm:$0xff]  ;;  %v1117_v22 = vld [vmem:[%s1612_s12 + $0x20] sm:$0xff] }
 0x239   : >> { %v673_v20 = vstv %s663_s4  ;;  %s1626_s26 = sld [smem:[#allocation6 + %s727_s24]]  ;;  %s729_s27 = sadd.s32 52, %s1600_s30  ;;  %v1118_v28 = vld [vmem:[%s1612_s12 + $0xc0] sm:$0xff]  ;;  %v1119_v29 = vld [vmem:[%s1612_s12 + $0xc8] sm:$0xff]  ;;  %v1120_v36 = vld [vmem:[%s1612_s12 + $0x30] sm:$0xff] }
 0x23a   : >> { %v674_v23 = vmul.f32 %v673_v20, %v667_v17  ;;  %v675_v24 = vmul.f32 %v673_v20, %v668_v13  ;;  %v678_v25 = vstv %s665_s6  ;;  %s749_s28 = sadd.s32 4, %s1600_s30  ;;  %s1633_s4 = sld [smem:[#allocation6 + %s729_s27]]  ;;  %v1121_v37 = vld [vmem:[%s1612_s12 + $0x38] sm:$0xff]  ;;  %v1123_v44 = vld [vmem:[%s1612_s12 + $0xe0] sm:$0xff]  ;;  %v1124_v50 = vld [vmem:[%s1612_s12 + $0x48] sm:$0xff] }
 0x23b   : >> { %v679_v26 = vmul.f32 %v1114_v18, %v678_v25  ;;  %v680_v27 = vmul.f32 %v1115_v19, %v678_v25  ;;  %v695_v30 = vstv %s1605_s8  ;;  %s751_s5 = sadd.s32 53, %s1600_s30  ;;  %s1640_s6 = sld [smem:[#allocation6 + %s749_s28]]  ;;  %v1122_v43 = vld [vmem:[%s1612_s12 + $0xd8] sm:$0xff]  ;;  %v1125_v51 = vld [vmem:[%s1612_s12 + $0x50] sm:$0xff]  ;;  %v1128_v0 = vld [vmem:[%s1612_s12 + $0x60] sm:$0xff] }
 0x23c   : >> { %v676_v31 = vadd.f32 %v1322_v10, %v674_v23  ;;  %v677_v32 = vadd.f32 %v1318_v16, %v675_v24  ;;  %v696_v33 = vmul.f32 %v1116_v21, %v695_v30  ;;  %v697_v34 = vmul.f32 %v1117_v22, %v695_v30  ;;  %s771_s7 = sadd.s32 5, %s1600_s30  ;;  %s1646_s8 = sld [smem:[#allocation6 + %s751_s5]]  ;;  %v1126_v57 = vld [vmem:[%s1612_s12 + $0xf0] sm:$0xff]  ;;  %v1127_v58 = vld [vmem:[%s1612_s12 + $0xf8] sm:$0xff]  ;;  %v1129_v1 = vld [vmem:[%s1612_s12 + $0x68] sm:$0xff] }
 0x23d   : >> { %v700_v35 = vstv %s1608_s10  ;;  %v717_v38 = vstv %s1616_s20  ;;  %s773_s9 = sadd.s32 54, %s1600_s30  ;;  %s1652_s10 = sld [smem:[#allocation6 + %s771_s7]]  ;;  %v1130_v7 = vld [vmem:[%s1612_s12 + $0x108] sm:$0xff]  ;;  %v1131_v8 = vld [vmem:[%s1612_s12 + $0x110] sm:$0xff] }
 0x23e   : >> { %v681_v39 = vadd.f32 %v679_v26, %v676_v31  ;;  %v682_v40 = vadd.f32 %v680_v27, %v677_v32  ;;  %v701_v41 = vmul.f32 %v1118_v28, %v700_v35  ;;  %v702_v42 = vmul.f32 %v1119_v29, %v700_v35  ;;  %s793_s11 = sadd.s32 6, %s1600_s30  ;;  %s1658_s20 = sld [smem:[#allocation6 + %s773_s9]]  ;;  %v1132_v15 = vld [vmem:[%s1612_s12 + $0x78] sm:$0xff]  ;;  %v1133_v16 = vld [vmem:[%s1612_s12 + $0x80] sm:$0xff]  ;;  %v1135_v22 = vld [vmem:[%s1612_s12 + $0x128] sm:$0xff] }
 0x23f   : >> { %v722_v45 = vstv %s1621_s23  ;;  %v718_v48 = vmul.f32 %v1120_v36, %v717_v38  ;;  %v719_v49 = vmul.f32 %v1121_v37, %v717_v38  ;;  %v739_v52 = vstv %s1626_s26  ;;  %s795_s21 = sadd.s32 55, %s1600_s30  ;;  %s1664_s23 = sld [smem:[#allocation6 + %s793_s11]]  ;;  %v1134_v21 = vld [vmem:[%s1612_s12 + $0x120] sm:$0xff]  ;;  %v1136_v28 = vld [vmem:[%s1612_s12 + $0x90] sm:$0xff] }
 0x240   : >> { %v698_v46 = vadd.f32 %v696_v33, %v681_v39  ;;  %v699_v47 = vadd.f32 %v697_v34, %v682_v40  ;;  %v723_v55 = vmul.f32 %v1122_v43, %v722_v45  ;;  %v724_v56 = vmul.f32 %v1123_v44, %v722_v45  ;;  %s1669_s24 = sld [smem:[#allocation6 + %s795_s21]]  ;;  %v1137_v29 = vld [vmem:[%s1612_s12 + $0x98] sm:$0xff]  ;;  %v1139_v36 = vld [vmem:[%s1612_s12 + $0x140] sm:$0xff]  ;;  %p656_p8 = scmp.ge.s32.totalorder %s659_s29, 7  }
 0x241   : >> { %v744_v59 = vstv %s1633_s4  ;;  %v740_v62 = vmul.f32 %v1124_v50, %v739_v52  ;;  %v741_v63 = vmul.f32 %v1125_v51, %v739_v52  ;;  %v761_v2 = vstv %s1640_s6  ;;  %v1138_v35 = vld [vmem:[%s1612_s12 + $0x138] sm:$0xff] }
 0x242   : >> { %v703_v53 = vadd.f32 %v701_v41, %v698_v46  ;;  %v704_v54 = vadd.f32 %v702_v42, %v699_v47  ;;  %v745_v5 = vmul.f32 %v1126_v57, %v744_v59  ;;  %v746_v6 = vmul.f32 %v1127_v58, %v744_v59 }
 0x243   : >> { %v766_v9 = vstv %s1646_s8  ;;  %v762_v12 = vmul.f32 %v1128_v0, %v761_v2  ;;  %v763_v14 = vmul.f32 %v1129_v1, %v761_v2  ;;  %v783_v17 = vstv %s1652_s10 }
 0x244   : >> { %v720_v60 = vadd.f32 %v718_v48, %v703_v53  ;;  %v721_v61 = vadd.f32 %v719_v49, %v704_v54  ;;  %v767_v19 = vmul.f32 %v1130_v7, %v766_v9  ;;  %v768_v20 = vmul.f32 %v1131_v8, %v766_v9 }
 0x245   : >> { %v788_v23 = vstv %s1658_s20  ;;  %v784_v26 = vmul.f32 %v1132_v15, %v783_v17  ;;  %v785_v27 = vmul.f32 %v1133_v16, %v783_v17  ;;  %v805_v30 = vstv %s1664_s23 }
 0x246   : >> { %v725_v3 = vadd.f32 %v723_v55, %v720_v60  ;;  %v726_v4 = vadd.f32 %v724_v56, %v721_v61  ;;  %v789_v33 = vmul.f32 %v1134_v21, %v788_v23  ;;  %v790_v34 = vmul.f32 %v1135_v22, %v788_v23 }
 0x247   : >> { %v810_v37 = vstv %s1669_s24  ;;  %v806_v40 = vmul.f32 %v1136_v28, %v805_v30  ;;  %v807_v41 = vmul.f32 %v1137_v29, %v805_v30 }
 0x248   : >> { %v742_v10 = vadd.f32 %v740_v62, %v725_v3  ;;  %v743_v11 = vadd.f32 %v741_v63, %v726_v4  ;;  %v811_v44 = vmul.f32 %v1138_v35, %v810_v37  ;;  %v812_v45 = vmul.f32 %v1139_v36, %v810_v37 }
 0x249   : > { %v823_v4 = vlaneseq (%p656_p8) }
 0x24a   : >> { %v747_v13 = vadd.f32 %v745_v5, %v742_v10  ;;  %v748_v18 = vadd.f32 %v746_v6, %v743_v11 }
 0x24b   : > { %vm825_vm5 = vcmp.lt.s32.totalorder (%p656_p8), %v823_v4, 16  ;;  %vm1706_vm6 = vcmp.ge.s32.totalorder (%p656_p8), %v823_v4, 16  ;;  %vm1711_vm7 = vcmp.lt.s32.totalorder (%p656_p8), %v823_v4, 32  ;;  %vm1725_vm9 = vcmp.ge.s32.totalorder (%p656_p8), %v823_v4, 32 }
 0x24c   : >> { %v764_v24 = vadd.f32 %v762_v12, %v747_v13  ;;  %v765_v25 = vadd.f32 %v763_v14, %v748_v18  ;;  %vm837_vm8 = vmand (%p656_p8), %vm1706_vm6, %vm1711_vm7  ;;  %vm1730_vm10 = vcmp.lt.s32.totalorder (%p656_p8), %v823_v4, 48  ;;  %vm1735_vm11 = vcmp.ge.s32.totalorder (%p656_p8), %v823_v4, 48 }
 0x24d   : > { %vm1740_vm12 = vcmp.lt.s32.totalorder (%p656_p8), %v823_v4, 64  ;;  %vm847_vm13 = vmand (%p656_p8), %vm1725_vm9, %vm1730_vm10  ;;  %vm1763_vm15 = vcmp.ge.s32.totalorder (%p656_p8), %v823_v4, 64  ;;  %vm1768_vm0 = vcmp.lt.s32.totalorder (%p656_p8), %v823_v4, 80  ;;  %vm1773_vm1 = vcmp.ge.s32.totalorder (%p656_p8), %v823_v4, 80 }
 0x24e   : >> { %v769_v31 = vadd.f32 %v767_v19, %v764_v24  ;;  %v770_v32 = vadd.f32 %v768_v20, %v765_v25  ;;  %vm1851_vm14 = vmand (%p656_p8), %vm1735_vm11, %vm1740_vm12  ;;  %vm1778_vm2 = vcmp.lt.s32.totalorder (%p656_p8), %v823_v4, 96  ;;  %vm895_vm7 = vcmp.ge.s32.totalorder (%p656_p8), %v823_v4, 112 }
 0x24f   : > { %vm1852_vm3 = vmand (%p656_p8), %vm1763_vm15, %vm1768_vm0 }
 0x250   : >> { %v786_v38 = vadd.f32 %v784_v26, %v769_v31  ;;  %v787_v39 = vadd.f32 %v785_v27, %v770_v32  ;;  %vm877_vm4 = vmand (%p656_p8), %vm1773_vm1, %vm1778_vm2 }
 0x251   : > { %vm1882_vm6 = vmand (%p656_p8), %vm1763_vm15, %vm1768_vm0 }
 0x252   : >> { %v791_v42 = vadd.f32 %v789_v33, %v786_v38  ;;  %v792_v43 = vadd.f32 %v790_v34, %v787_v39 }
 0x254   : >> { %v808_v46 = vadd.f32 %v806_v40, %v791_v42  ;;  %v809_v47 = vadd.f32 %v807_v41, %v792_v43  ;;  %658 = sbr.rel (!%p656_p8) target bundleno = 561 (0x231), region = 144 }
 0x256   : >> { %v813_v48 = vadd.f32 %v811_v44, %v808_v46   ;;  %v814_v49 = vadd.f32 %v812_v45, %v809_v47  }
 0x258   : >> { %v1855_v16 = vmov %v814_v49  ;;  %v1856_v10 = vmov %v813_v48  ;;  %v815_v50 = vmul.f32 (%p656_p8), 0.5, %v813_v48  ;;  %v816_v58 = vmul.f32 (%p656_p8), 0.5, %v814_v49 }
 0x25a   : > { %1245 = vtanh.f32 %v815_v50 }
 0x25b   : > { %1247 = vtanh.f32 %v816_v58 }
 0x260   : > { %v1246_v51 = vpop.eup %1245 }
 0x261   : > { %v819_v52 = vadd.f32 1.0, %v1246_v51  ;;  %v1248_v60 = vpop.eup %1247 }
 0x262   : > { %v820_v62 = vadd.f32 1.0, %v1248_v60 }
 0x263   : > { %v821_v53 = vmul.f32 0.5, %v819_v52 }
 0x264   : > { %v822_v63 = vmul.f32 0.5, %v820_v62 }
 0x265   : > { %829 = vst [vmem:[#allocation1] sm:$0xff] %v821_v53 }
 0x266   : > { %827 = vst.msk [vmem:[#allocation4] sm:$0x1] %vm825_vm5, %v821_v53 }
 0x267   : > { %899 = vst.msk [vmem:[#allocation4 + $0x1] sm:$0x1] %vm825_vm5, %v822_v63  ;;  %vm1801_vm5 = vcmp.ge.s32.totalorder %v823_v4, 96 }
 0x26c   : > { %v831_v54 = vld [vmem:[#allocation1 + $0x1] ss:$9 sm:$0xff] }
 0x26d   : > { %832 = vrot.lane.b32.xlu0 %v831_v54, %s1348_s19  ;;  %839 = vst [vmem:[#allocation1] sm:$0xff] %v821_v53 }
 0x274   : > { %v841_v55 = vld [vmem:[#allocation1 + $0x2] ss:$9 sm:$0xff] }
 0x275   : > { %842 = vrot.lane.b32.xlu1 %v841_v55, %s1347_s1  ;;  %849 = vst [vmem:[#allocation1] sm:$0xff] %v821_v53 }
 0x27c   : > { %v851_v56 = vld [vmem:[#allocation1 + $0x3] ss:$9 sm:$0xff] }
 0x27d   : > { %859 = vst [vmem:[#allocation1] sm:$0xff] %v821_v53  ;;  %852 = vrot.lane.b32.xlu2 %v851_v56, %s1346_s18 }
 0x284   : > { %v861_v57 = vld [vmem:[#allocation1 + $0x4] ss:$9 sm:$0xff] }
 0x285   : > { %862 = vrot.lane.b32.xlu0 %v861_v57, %s1345_s17  ;;  %869 = vst [vmem:[#allocation1] sm:$0xff] %v821_v53 }
 0x28c   : > { %v871_v59 = vld [vmem:[#allocation1 + $0x5] ss:$9 sm:$0xff] }
 0x28d   : > { %879 = vst [vmem:[#allocation1] sm:$0xff] %v821_v53  ;;  %872 = vrot.lane.b32.xlu2 %v871_v59, %s1344_s16 }
 0x294   : > { %v881_v61 = vld [vmem:[#allocation1 + $0x6] ss:$9 sm:$0xff] }
 0x295   : > { %882 = vrot.lane.b32.xlu1 %v881_v61, %s1342_s15  ;;  %889 = vst [vmem:[#allocation1] sm:$0xff] %v821_v53 }
 0x29c   : > { %v891_v0 = vld [vmem:[#allocation1 + $0x7] ss:$9 sm:$0xff] }
 0x29d   : > { %901 = vst [vmem:[#allocation1] sm:$0xff] %v822_v63 }
 0x2a4   : > { %v903_v1 = vld [vmem:[#allocation1 + $0x1] ss:$9 sm:$0xff] }
 0x2a5   : > { %904 = vrot.lane.b32.xlu0 %v903_v1, %s1348_s19  ;;  %908 = vst [vmem:[#allocation1] sm:$0xff] %v822_v63 }
 0x2ac   : > { %v910_v2 = vld [vmem:[#allocation1 + $0x2] ss:$9 sm:$0xff] }
 0x2ad   : > { %911 = vrot.lane.b32.xlu1 %v910_v2, %s1347_s1  ;;  %915 = vst [vmem:[#allocation1] sm:$0xff] %v822_v63 }
 0x2b4   : > { %v917_v3 = vld [vmem:[#allocation1 + $0x3] ss:$9 sm:$0xff] }
 0x2b5   : > { %922 = vst [vmem:[#allocation1] sm:$0xff] %v822_v63  ;;  %918 = vrot.lane.b32.xlu2 %v917_v3, %s1346_s18 }
 0x2bc   : > { %v924_v5 = vld [vmem:[#allocation1 + $0x4] ss:$9 sm:$0xff] }
 0x2bd   : > { %925 = vrot.lane.b32.xlu1 %v924_v5, %s1345_s17  ;;  %929 = vst [vmem:[#allocation1] sm:$0xff] %v822_v63 }
 0x2c4   : > { %v931_v6 = vld [vmem:[#allocation1 + $0x5] ss:$9 sm:$0xff] }
 0x2c5   : > { %932 = vrot.lane.b32.xlu0 %v931_v6, %s1344_s16  ;;  %936 = vst [vmem:[#allocation1] sm:$0xff] %v822_v63 }
 0x2cc   : > { %v938_v7 = vld [vmem:[#allocation1 + $0x6] ss:$9 sm:$0xff] }
 0x2cd   : > { %943 = vst [vmem:[#allocation1] sm:$0xff] %v822_v63  ;;  %892 = vrot.lane.b32.xlu0 %v891_v0, %s1341_s13  ;;  %939 = vrot.lane.b32.xlu2 %v938_v7, %s1342_s15 }
 0x2d4   : > { %v945_v8 = vld [vmem:[#allocation1 + $0x7] ss:$9 sm:$0xff] }
 0x2d5   : > { %946 = vrot.lane.b32.xlu1 %v945_v8, %s1341_s13  ;;  %s1328_s13 = smov 0  }
 0x2d7   : > { %v853_v13 = vpop.permute.xlu2 %852 }
 0x2df   : > { %v833_v11 = vpop.permute.xlu0 %832 }
 0x2e0   : > { %838 = vst.msk [vmem:[#allocation4] sm:$0x1] %vm837_vm8, %v833_v11 }
 0x2e7   : > { %v843_v17 = vpop.permute.xlu1 %842  ;;  %v873_v22 = vpop.permute.xlu2 %872 }
 0x2e8   : > { %848 = vst.msk [vmem:[#allocation4] sm:$0x1] %vm847_vm13, %v843_v17 }
 0x2e9   : > { %858 = vst.msk [vmem:[#allocation4] sm:$0x1] %vm1851_vm14, %v853_v13  ;;  %vm1806_vm14 = vcmp.lt.s32.totalorder %v823_v4, 112 }
 0x2f7   : > { %v863_v23 = vpop.permute.xlu0 %862 }
 0x2f8   : > { %868 = vst.msk [vmem:[#allocation4] sm:$0x1] %vm1852_vm3, %v863_v23  ;;  %vm887_vm3 = vmand %vm1801_vm5, %vm1806_vm14 }
 0x2f9   : > { %878 = vst.msk [vmem:[#allocation4] sm:$0x1] %vm877_vm4, %v873_v22  ;;  %vm1881_vm14 = vmand %vm1735_vm11, %vm1740_vm12 }
 0x307   : > { %v883_v26 = vpop.permute.xlu1 %882 }
 0x308   : > { %888 = vst.msk [vmem:[#allocation4] sm:$0x1] %vm887_vm3, %v883_v26 }
 0x30f   : > { %v919_v28 = vpop.permute.xlu2 %918 }
 0x317   : > { %v905_v27 = vpop.permute.xlu0 %904 }
 0x318   : > { %907 = vst.msk [vmem:[#allocation4 + $0x1] sm:$0x1] %vm837_vm8, %v905_v27  ;;  %vm896_vm8 = vcmp.lt.s32.totalorder %v823_v4, 128 }
 0x319   : > { %vm897_vm9 = vmand %vm895_vm7, %vm896_vm8 }
 0x31f   : > { %v912_v29 = vpop.permute.xlu1 %911 }
 0x320   : > { %914 = vst.msk [vmem:[#allocation4 + $0x1] sm:$0x1] %vm847_vm13, %v912_v29 }
 0x321   : > { %921 = vst.msk [vmem:[#allocation4 + $0x1] sm:$0x1] %vm1881_vm14, %v919_v28 }
 0x327   : > { %v940_v31 = vpop.permute.xlu2 %939 }
 0x32f   : > { %v926_v30 = vpop.permute.xlu1 %925 }
 0x330   : > { %928 = vst.msk [vmem:[#allocation4 + $0x1] sm:$0x1] %vm1882_vm6, %v926_v30 }
 0x337   : > { %v933_v32 = vpop.permute.xlu0 %932 }
 0x338   : > { %935 = vst.msk [vmem:[#allocation4 + $0x1] sm:$0x1] %vm877_vm4, %v933_v32 }
 0x339   : > { %942 = vst.msk [vmem:[#allocation4 + $0x1] sm:$0x1] %vm887_vm3, %v940_v31 }
 0x33f   : > { %v893_v33 = vpop.permute.xlu0 %892 }
 0x340   : > { %898 = vst.msk [vmem:[#allocation4] sm:$0x1] %vm897_vm9, %v893_v33 }
 0x347   : > { %v947_v34 = vpop.permute.xlu1 %946 }
 0x348   : > { %949 = vst.msk [vmem:[#allocation4 + $0x1] sm:$0x1] %vm897_vm9, %v947_v34 }
 0x34f   : > { %v950_v35 = vld [vmem:[#allocation4] sm:$0x3] }
 0x350 LB: >> { %s957_s15 = sshra.s32 %s1330_s13, 2  ;;  %s960_s16 = sand.u32 3, %s1330_s13  ;;  %vm967_vm10 = vcmp.lt.s32.totalorder %v823_v4, 256  ;;  %s1330_s13 = sphi %s1328_s13, %s956_s13  }
 0x351   : >> { %s1147_s17 = sshll.u32 %s957_s15, 3  ;;  %s956_s13 = sadd.s32 1, %s1330_s13  }
 0x352   : >> { %s963_s18 = sadd.s32 %s1147_s17, %s960_s16  ;;  %p953_p9 = scmp.ge.s32.totalorder %s956_s13, 4  }
 0x353   : >> { %s964_s1 = scalar_lea.vmem %s1392_s22, %s963_s18  ;;  %s969_s19 = scalar_lea.vmem %s1397_s25, %s963_s18 }
 0x354   : >> { %v965_v36 = vld [vmem:[%s964_s1] ss:$4 sm:$0x3]  ;;  %955 = sbr.rel (!%p953_p9) target bundleno = 848 (0x350), region = 155 }
 0x355   : >> { %v966_v37 = vmul.f32 %v965_v36, %v950_v35 }
 0x357   : >> { %970 = vst.msk [vmem:[%s969_s19] ss:$4 sm:$0x3] %vm967_vm10, %v966_v37 }
 0x359 PF: > { %s15_s14 = sadd.s32 1, %s1302_s14  }
 0x35a   : > { %p12_p10 = scmp.ge.s32.totalorder %s15_s14, 4  }
 0x35c   :  { %14 = sbr.rel (!%p12_p10) target bundleno = 3 (0x3), region = 166 }
 0x361   :  { %992 = vsyncpa [#allocation7], 1 }
 0x362   :  { %994 = vsyncpa [#allocation7 + $0x1], 1 }

</bundles_post_ra>
